<compile_context>
chip_gen: v7x
topology: tpu7x:2x2x1
jax: 0.10.0
libtpu: 0.0.40
codegen_flags: <defaults>
</compile_context>

<pallas_src>
import numpy as np
import jax
import jax.numpy as jnp
from jax.experimental import pallas as pl
from jax.experimental.pallas import tpu as pltpu

EMBED_DIM = 32
NUM_HEADS = 4
HEAD_DIM = EMBED_DIM // NUM_HEADS
SEQ = 16
BATCH = 2


def self_block_kernel(x_ref, enc_ref, wstack_ref, bstack_ref, w1x_ref, w1m_ref,
                      w2_ref, vec_ref, o_ref):
    D, H, hd = EMBED_DIM, NUM_HEADS, HEAD_DIM
    bb, N, _ = x_ref.shape          # bb = batches handled by this grid step
    R = bb * N                      # token rows handled by this grid step

    x2 = x_ref[...].reshape(R, D)                 # [R, D]
    enc2 = enc_ref[...].reshape(R, 2 * D)         # [cos tiled over heads | sin tiled]
    cos_t = enc2[:, :D]
    sin_t = enc2[:, D:]

    # --- single lane-dense fused projection: [q*s | rot(q)*s | k | rot(k) | v] ---
    proj = (jnp.dot(x2, wstack_ref[...], preferred_element_type=jnp.float32)
            + bstack_ref[...])                    # [R, 5*D]

    # rotary (rotate_half + attention scale pre-folded into the weights) -> pure VPU
    q = proj[:, 0 * D:1 * D] * cos_t + proj[:, 1 * D:2 * D] * sin_t   # [R, D] (scaled)
    k = proj[:, 2 * D:3 * D] * cos_t + proj[:, 3 * D:4 * D] * sin_t   # [R, D]
    v = proj[:, 4 * D:5 * D]                                          # [R, D]

    # --- head split [R, D] -> [bb*H, N, hd] (static slices, no data-dependent work) ---
    def split_heads(t):
        return jnp.stack(
            [t[b * N:(b + 1) * N, h * hd:(h + 1) * hd]
             for b in range(bb) for h in range(H)], axis=0)

    qg, kg, vg = split_heads(q), split_heads(k), split_heads(v)

    # --- batched-head attention (scale already folded into q) ---
    s = jnp.einsum('gqd,gkd->gqk', qg, kg, preferred_element_type=jnp.float32)
    s = s - jnp.max(s, axis=-1, keepdims=True)
    p = jnp.exp(s)
    p = p * pl.reciprocal(jnp.sum(p, axis=-1, keepdims=True), approx=True)
    ctx = jnp.einsum('gqk,gkd->gqd', p, vg, preferred_element_type=jnp.float32)  # [G,N,hd]

    # merge heads back to head-major columns (= context.transpose(1,2).flatten order)
    ctx2 = jnp.concatenate(
        [jnp.concatenate([ctx[b * H + h] for h in range(H)], axis=-1)
         for b in range(bb)], axis=0)             # [R, D]

    vec = vec_ref[...]                            # packed small vectors [4, 2D]
    b1p, ln_g, ln_b = vec[0], vec[1], vec[2]
    b2 = vec[3, :D]

    # --- FFN: out_proj folded into the message branch of linear1 (w1m = Wo @ W1[D:]) ---
    y = (jnp.dot(x2, w1x_ref[...], preferred_element_type=jnp.float32)
         + jnp.dot(ctx2, w1m_ref[...], preferred_element_type=jnp.float32) + b1p)
    mu = jnp.mean(y, axis=-1, keepdims=True)
    var = jnp.mean((y - mu) ** 2, axis=-1, keepdims=True)
    yn = (y - mu) * jax.lax.rsqrt(var + 1e-5) * ln_g + ln_b
    # tanh-approx GELU -> EUP slot (erf polynomial would occupy VALU slots)
    c = 0.7978845608028654  # sqrt(2/pi)
    ge = 0.5 * yn * (1.0 + jnp.tanh(c * (yn + 0.044715 * yn * yn * yn)))
    out2 = x2 + jnp.dot(ge, w2_ref[...], preferred_element_type=jnp.float32) + b2

    o_ref[...] = out2.reshape(bb, N, D).astype(o_ref.dtype)


def _tensorcores_per_chip():
    """Conservative detection: 2 only on v7x; anything else (or failure) -> 1."""
    try:
        kind = jax.devices()[0].device_kind.lower()
        if "v7" in kind or "7x" in kind:
            return 2
    except Exception:
        pass
    return 1


def self_block(x, enc_packed, kp):
    """x: [B,N,D]; enc_packed: [B,N,2D]; kp: packed kernel params."""
    B, N, D = x.shape
    n_tc = _tensorcores_per_chip()
    # Fold all batches into one grid step on single-TC chips; one batch per step on v7x.
    bb = B if (n_tc <= 1 or B % n_tc != 0) else B // n_tc
    grid = (B // bb,)

    def _full(shape):
        n = len(shape)
        return pl.BlockSpec(shape, lambda b, n=n: (0,) * n)

    in_specs = [
        pl.BlockSpec((bb, N, D), lambda b: (b, 0, 0)),            # x
        pl.BlockSpec((bb, N, 2 * D), lambda b: (b, 0, 0)),        # packed cos|sin (tiled)
        _full(kp["wstack"].shape),                                # [D, 5D] fused proj W
        _full(kp["bstack"].shape),                                # [1, 5D] fused proj b
        _full(kp["w1x"].shape),                                   # W1[:D]        [D, 2D]
        _full(kp["w1m"].shape),                                   # Wo @ W1[D:]   [D, 2D]
        _full(kp["w2"].shape),                                    # W2            [2D, D]
        _full(kp["vec"].shape),                                   # packed vectors [4, 2D]
    ]
    return pl.pallas_call(
        self_block_kernel,
        out_shape=jax.ShapeDtypeStruct((B, N, D), x.dtype),
        grid=grid,
        in_specs=in_specs,
        out_specs=pl.BlockSpec((bb, N, D), lambda b: (b, 0, 0)),
        compiler_params=pltpu.CompilerParams(dimension_semantics=("parallel",)),
    )(x, enc_packed, kp["wstack"], kp["bstack"], kp["w1x"], kp["w1m"], kp["w2"], kp["vec"])


def make_params(key):
    """Base (PyTorch-equivalent) parameters, weights pre-transposed to [in, out]."""
    D, H, hd = EMBED_DIM, NUM_HEADS, HEAD_DIM
    ks = jax.random.split(key, 12)

    # Wqkv as in the module: Linear(D, 3D); output unflattened into (H, hd, 3).
    wqkv = jax.random.normal(ks[0], (3 * D, D), jnp.float32) * 0.1
    bqkv = jax.random.normal(ks[1], (3 * D,), jnp.float32) * 0.01
    w_hd3 = wqkv.reshape(H, hd, 3, D)
    b_hd3 = bqkv.reshape(H, hd, 3)
    wq = w_hd3[:, :, 0, :].reshape(D, D).T      # [D_in, D_out], head-major output columns
    wk = w_hd3[:, :, 1, :].reshape(D, D).T
    wv = w_hd3[:, :, 2, :].reshape(D, D).T
    bq = b_hd3[:, :, 0].reshape(1, D)
    bk = b_hd3[:, :, 1].reshape(1, D)
    bv = b_hd3[:, :, 2].reshape(1, D)

    wo = (jax.random.normal(ks[2], (D, D), jnp.float32) * 0.1).T
    bo = (jax.random.normal(ks[3], (D,), jnp.float32) * 0.01).reshape(1, D)

    w1 = (jax.random.normal(ks[4], (2 * D, 2 * D), jnp.float32) * 0.1).T
    b1 = (jax.random.normal(ks[5], (2 * D,), jnp.float32) * 0.01).reshape(1, 2 * D)
    ln_g = (1.0 + 0.1 * jax.random.normal(ks[6], (2 * D,), jnp.float32)).reshape(1, 2 * D)
    ln_b = (0.1 * jax.random.normal(ks[7], (2 * D,), jnp.float32)).reshape(1, 2 * D)
    w2 = (jax.random.normal(ks[8], (D, 2 * D), jnp.float32) * 0.1).T
    b2 = (jax.random.normal(ks[9], (D,), jnp.float32) * 0.01).reshape(1, D)

    return dict(wq=wq, wk=wk, wv=wv, bq=bq, bk=bk, bv=bv, wo=wo, bo=bo,
                w1=w1, b1=b1, ln_g=ln_g, ln_b=ln_b, w2=w2, b2=b2)


def pack_kernel_params(p):
    """Wrapper-side packing: fold scale + rotate_half into the projection weights,
    fold out_proj into the FFN message branch, and pack small vectors."""
    D, H, hd = EMBED_DIM, NUM_HEADS, HEAD_DIM
    scale = float(hd) ** -0.5

    # Block-diagonal rotate_half over the full embed dim: (t @ Rb)[2i] = -t[2i+1],
    # (t @ Rb)[2i+1] = t[2i]  (pairs never cross head boundaries since hd is even).
    Rb = np.zeros((D, D), np.float32)
    for j in range(0, D, 2):
        Rb[j + 1, j] = -1.0
        Rb[j, j + 1] = 1.0
    Rb = jnp.asarray(Rb)

    # Component-major column order: [q*scale | rot(q)*scale | k | rot(k) | v],
    # each block D wide (32-lane aligned slices in the kernel).
    wstack = jnp.concatenate(
        [p["wq"] * scale, (p["wq"] @ Rb) * scale, p["wk"], p["wk"] @ Rb, p["wv"]],
        axis=1)                                                    # [D, 5D]
    bstack = jnp.concatenate(
        [p["bq"] * scale, (p["bq"] @ Rb) * scale, p["bk"], p["bk"] @ Rb, p["bv"]],
        axis=1)                                                    # [1, 5D]

    # FFN with out_proj folded into the message branch of linear1.
    w1x = p["w1"][:D, :]                          # [D, 2D]
    w1m = p["wo"] @ p["w1"][D:, :]                # [D, 2D]
    b1p = p["b1"] + p["bo"] @ p["w1"][D:, :]      # [1, 2D]

    vec = jnp.stack([b1p[0], p["ln_g"][0], p["ln_b"][0],
                     jnp.concatenate([p["b2"][0], jnp.zeros((D,), jnp.float32)])],
                    axis=0)                        # [4, 2D]

    return dict(wstack=wstack, bstack=bstack, w1x=w1x, w1m=w1m, w2=p["w2"], vec=vec)


def pack_encoding(enc):
    """enc [B,2,N,hd] -> [B,N,2D]: cos/sin tiled over heads (head-major columns)."""
    cos = jnp.tile(enc[:, 0], (1, 1, NUM_HEADS))   # [B, N, D]
    sin = jnp.tile(enc[:, 1], (1, 1, NUM_HEADS))   # [B, N, D]
    return jnp.concatenate([cos, sin], axis=-1)    # [B, N, 2D]


def reference(x, enc, p):
    """Pure-JAX replication of the PyTorch SelfBlock.forward (mask=None)."""
    B, N, D = x.shape
    H, hd = NUM_HEADS, HEAD_DIM
    q = x @ p["wq"] + p["bq"][0]
    k = x @ p["wk"] + p["bk"][0]
    v = x @ p["wv"] + p["bv"][0]
    q = q.reshape(B, N, H, hd).transpose(0, 2, 1, 3)
    k = k.reshape(B, N, H, hd).transpose(0, 2, 1, 3)
    v = v.reshape(B, N, H, hd).transpose(0, 2, 1, 3)
    cos = enc[:, 0][:, None]     # [B, 1, N, hd]
    sin = enc[:, 1][:, None]

    def rot_half(t):
        t1 = t[..., 0::2]
        t2 = t[..., 1::2]
        return jnp.stack([-t2, t1], axis=-1).reshape(t.shape)

    q = q * cos + rot_half(q) * sin
    k = k * cos + rot_half(k) * sin
    s = jnp.einsum("bhnd,bhmd->bhnm", q, k) * (hd ** -0.5)
    a = jax.nn.softmax(s, axis=-1)
    ctx = jnp.einsum("bhnm,bhmd->bhnd", a, v).transpose(0, 2, 1, 3).reshape(B, N, D)
    msg = ctx @ p["wo"] + p["bo"][0]
    cat = jnp.concatenate([x, msg], axis=-1)
    y = cat @ p["w1"] + p["b1"][0]
    mu = y.mean(-1, keepdims=True)
    var = ((y - mu) ** 2).mean(-1, keepdims=True)
    yn = (y - mu) / jnp.sqrt(var + 1e-5) * p["ln_g"][0] + p["ln_b"][0]
    ge = 0.5 * yn * (1.0 + jax.scipy.special.erf(yn / jnp.sqrt(2.0)))
    return x + ge @ p["w2"] + p["b2"][0]


if __name__ == "__main__":
    key = jax.random.PRNGKey(0)
    kx, ke, kp = jax.random.split(key, 3)

    x = jax.random.normal(kx, (BATCH, SEQ, EMBED_DIM), jnp.float32) * 0.5

    # rotary-style encoding: cos/sin of random phases, repeat-interleaved by 2 over head_dim
    theta = jax.random.normal(ke, (BATCH, SEQ, HEAD_DIM // 2), jnp.float32)
    cos = jnp.repeat(jnp.cos(theta), 2, axis=-1)
    sin = jnp.repeat(jnp.sin(theta), 2, axis=-1)
    enc = jnp.stack([cos, sin], axis=1)          # [B, 2, N, head_dim]

    params = make_params(kp)
    kparams = pack_kernel_params(params)         # one-time wrapper-side packing
    enc_packed = pack_encoding(enc)              # one-time wrapper-side packing

    out = self_block(x, enc_packed, kparams)
    out = jax.block_until_ready(out)

    ref = jax.block_until_ready(reference(x, enc, params))
    assert out.shape == (BATCH, SEQ, EMBED_DIM)
    np.testing.assert_allclose(np.asarray(out), np.asarray(ref), atol=2e-3, rtol=2e-3)

    print("KERNEL_OK")
</pallas_src>

<mosaic_0001>
module attributes {stable_mosaic.version = 11 : i64} {
  func.func @self_block_kernel(%arg0: i32, %arg1: memref<2x16x32xf32, #tpu.memory_space<vmem>>, %arg2: memref<2x16x64xf32, #tpu.memory_space<vmem>>, %arg3: memref<32x160xf32, #tpu.memory_space<vmem>>, %arg4: memref<1x160xf32, #tpu.memory_space<vmem>>, %arg5: memref<32x64xf32, #tpu.memory_space<vmem>>, %arg6: memref<32x64xf32, #tpu.memory_space<vmem>>, %arg7: memref<64x32xf32, #tpu.memory_space<vmem>>, %arg8: memref<4x64xf32, #tpu.memory_space<vmem>>, %arg9: memref<2x16x32xf32, #tpu.memory_space<vmem>>) attributes {dimension_semantics = [#tpu.dimension_semantics<parallel>], iteration_bounds = array<i64: 1>, scalar_prefetch = 0 : i64, scratch_operands = 0 : i64, tpu.core_type = #tpu.core_type<tc>, window_params = [{transform_indices = @transform_0, window_bounds = array<i64: 2, 16, 32>}, {transform_indices = @transform_1, window_bounds = array<i64: 2, 16, 64>}, {pipeline_mode = #tpu.pipeline_mode<synchronous>, transform_indices = @transform_2, window_bounds = array<i64: 32, 160>}, {pipeline_mode = #tpu.pipeline_mode<synchronous>, transform_indices = @transform_3, window_bounds = array<i64: 1, 160>}, {pipeline_mode = #tpu.pipeline_mode<synchronous>, transform_indices = @transform_4, window_bounds = array<i64: 32, 64>}, {pipeline_mode = #tpu.pipeline_mode<synchronous>, transform_indices = @transform_5, window_bounds = array<i64: 32, 64>}, {pipeline_mode = #tpu.pipeline_mode<synchronous>, transform_indices = @transform_6, window_bounds = array<i64: 64, 32>}, {pipeline_mode = #tpu.pipeline_mode<synchronous>, transform_indices = @transform_7, window_bounds = array<i64: 4, 64>}, {transform_indices = @transform_8, window_bounds = array<i64: 2, 16, 32>}]} {
    %c0 = arith.constant 0 : index
    %c0_0 = arith.constant 0 : index
    %c0_1 = arith.constant 0 : index
    %0 = vector.load %arg1[%c0, %c0_0, %c0_1] : memref<2x16x32xf32, #tpu.memory_space<vmem>>, vector<2x16x32xf32>
    %1 = vector.shape_cast %0 : vector<2x16x32xf32> to vector<32x32xf32>
    %c0_2 = arith.constant 0 : index
    %c0_3 = arith.constant 0 : index
    %c0_4 = arith.constant 0 : index
    %2 = vector.load %arg2[%c0_2, %c0_3, %c0_4] : memref<2x16x64xf32, #tpu.memory_space<vmem>>, vector<2x16x64xf32>
    %3 = vector.shape_cast %2 : vector<2x16x64xf32> to vector<32x64xf32>
    %4 = vector.extract_strided_slice %3 {offsets = [0, 0], sizes = [32, 32], strides = [1, 1]} : vector<32x64xf32> to vector<32x32xf32>
    %5 = vector.extract_strided_slice %3 {offsets = [0, 32], sizes = [32, 32], strides = [1, 1]} : vector<32x64xf32> to vector<32x32xf32>
    %c0_5 = arith.constant 0 : index
    %c0_6 = arith.constant 0 : index
    %6 = vector.load %arg3[%c0_5, %c0_6] : memref<32x160xf32, #tpu.memory_space<vmem>>, vector<32x160xf32>
    %cst = arith.constant dense<0.000000e+00> : vector<32x160xf32>
    %7 = tpu.matmul %1, %6, %cst {dimension_numbers = #tpu.dot_dimension_numbers<[1], [0], [0], [1], [0, 0, 1, 1], [], []>} : vector<32x32xf32>, vector<32x160xf32>, vector<32x160xf32> -> vector<32x160xf32>
    %c0_7 = arith.constant 0 : index
    %c0_8 = arith.constant 0 : index
    %8 = vector.load %arg4[%c0_7, %c0_8] : memref<1x160xf32, #tpu.memory_space<vmem>>, vector<1x160xf32>
    %9 = vector.broadcast %8 : vector<1x160xf32> to vector<32x160xf32>
    %10 = arith.addf %7, %9 : vector<32x160xf32>
    %11 = vector.extract_strided_slice %10 {offsets = [0, 0], sizes = [32, 32], strides = [1, 1]} : vector<32x160xf32> to vector<32x32xf32>
    %12 = arith.mulf %11, %4 : vector<32x32xf32>
    %13 = vector.extract_strided_slice %10 {offsets = [0, 32], sizes = [32, 32], strides = [1, 1]} : vector<32x160xf32> to vector<32x32xf32>
    %14 = arith.mulf %13, %5 : vector<32x32xf32>
    %15 = arith.addf %12, %14 : vector<32x32xf32>
    %16 = vector.extract_strided_slice %10 {offsets = [0, 64], sizes = [32, 32], strides = [1, 1]} : vector<32x160xf32> to vector<32x32xf32>
    %17 = arith.mulf %16, %4 : vector<32x32xf32>
    %18 = vector.extract_strided_slice %10 {offsets = [0, 96], sizes = [32, 32], strides = [1, 1]} : vector<32x160xf32> to vector<32x32xf32>
    %19 = arith.mulf %18, %5 : vector<32x32xf32>
    %20 = arith.addf %17, %19 : vector<32x32xf32>
    %21 = vector.extract_strided_slice %10 {offsets = [0, 128], sizes = [32, 32], strides = [1, 1]} : vector<32x160xf32> to vector<32x32xf32>
    %22 = vector.extract_strided_slice %15 {offsets = [0, 0], sizes = [16, 8], strides = [1, 1]} : vector<32x32xf32> to vector<16x8xf32>
    %23 = vector.extract_strided_slice %15 {offsets = [0, 8], sizes = [16, 8], strides = [1, 1]} : vector<32x32xf32> to vector<16x8xf32>
    %24 = vector.extract_strided_slice %15 {offsets = [0, 16], sizes = [16, 8], strides = [1, 1]} : vector<32x32xf32> to vector<16x8xf32>
    %25 = vector.extract_strided_slice %15 {offsets = [0, 24], sizes = [16, 8], strides = [1, 1]} : vector<32x32xf32> to vector<16x8xf32>
    %26 = vector.extract_strided_slice %15 {offsets = [16, 0], sizes = [16, 8], strides = [1, 1]} : vector<32x32xf32> to vector<16x8xf32>
    %27 = vector.extract_strided_slice %15 {offsets = [16, 8], sizes = [16, 8], strides = [1, 1]} : vector<32x32xf32> to vector<16x8xf32>
    %28 = vector.extract_strided_slice %15 {offsets = [16, 16], sizes = [16, 8], strides = [1, 1]} : vector<32x32xf32> to vector<16x8xf32>
    %29 = vector.extract_strided_slice %15 {offsets = [16, 24], sizes = [16, 8], strides = [1, 1]} : vector<32x32xf32> to vector<16x8xf32>
    %30 = vector.shape_cast %22 : vector<16x8xf32> to vector<1x16x8xf32>
    %31 = vector.shape_cast %23 : vector<16x8xf32> to vector<1x16x8xf32>
    %32 = vector.shape_cast %24 : vector<16x8xf32> to vector<1x16x8xf32>
    %33 = vector.shape_cast %25 : vector<16x8xf32> to vector<1x16x8xf32>
    %34 = vector.shape_cast %26 : vector<16x8xf32> to vector<1x16x8xf32>
    %35 = vector.shape_cast %27 : vector<16x8xf32> to vector<1x16x8xf32>
    %36 = vector.shape_cast %28 : vector<16x8xf32> to vector<1x16x8xf32>
    %37 = vector.shape_cast %29 : vector<16x8xf32> to vector<1x16x8xf32>
    %38 = tpu.concatenate %30, %31, %32, %33, %34, %35, %36, %37 in 0 : vector<1x16x8xf32>, vector<1x16x8xf32>, vector<1x16x8xf32>, vector<1x16x8xf32>, vector<1x16x8xf32>, vector<1x16x8xf32>, vector<1x16x8xf32>, vector<1x16x8xf32> -> vector<8x16x8xf32>
    %39 = vector.extract_strided_slice %20 {offsets = [0, 0], sizes = [16, 8], strides = [1, 1]} : vector<32x32xf32> to vector<16x8xf32>
    %40 = vector.extract_strided_slice %20 {offsets = [0, 8], sizes = [16, 8], strides = [1, 1]} : vector<32x32xf32> to vector<16x8xf32>
    %41 = vector.extract_strided_slice %20 {offsets = [0, 16], sizes = [16, 8], strides = [1, 1]} : vector<32x32xf32> to vector<16x8xf32>
    %42 = vector.extract_strided_slice %20 {offsets = [0, 24], sizes = [16, 8], strides = [1, 1]} : vector<32x32xf32> to vector<16x8xf32>
    %43 = vector.extract_strided_slice %20 {offsets = [16, 0], sizes = [16, 8], strides = [1, 1]} : vector<32x32xf32> to vector<16x8xf32>
    %44 = vector.extract_strided_slice %20 {offsets = [16, 8], sizes = [16, 8], strides = [1, 1]} : vector<32x32xf32> to vector<16x8xf32>
    %45 = vector.extract_strided_slice %20 {offsets = [16, 16], sizes = [16, 8], strides = [1, 1]} : vector<32x32xf32> to vector<16x8xf32>
    %46 = vector.extract_strided_slice %20 {offsets = [16, 24], sizes = [16, 8], strides = [1, 1]} : vector<32x32xf32> to vector<16x8xf32>
    %47 = vector.shape_cast %39 : vector<16x8xf32> to vector<1x16x8xf32>
    %48 = vector.shape_cast %40 : vector<16x8xf32> to vector<1x16x8xf32>
    %49 = vector.shape_cast %41 : vector<16x8xf32> to vector<1x16x8xf32>
    %50 = vector.shape_cast %42 : vector<16x8xf32> to vector<1x16x8xf32>
    %51 = vector.shape_cast %43 : vector<16x8xf32> to vector<1x16x8xf32>
    %52 = vector.shape_cast %44 : vector<16x8xf32> to vector<1x16x8xf32>
    %53 = vector.shape_cast %45 : vector<16x8xf32> to vector<1x16x8xf32>
    %54 = vector.shape_cast %46 : vector<16x8xf32> to vector<1x16x8xf32>
    %55 = tpu.concatenate %47, %48, %49, %50, %51, %52, %53, %54 in 0 : vector<1x16x8xf32>, vector<1x16x8xf32>, vector<1x16x8xf32>, vector<1x16x8xf32>, vector<1x16x8xf32>, vector<1x16x8xf32>, vector<1x16x8xf32>, vector<1x16x8xf32> -> vector<8x16x8xf32>
    %56 = vector.extract_strided_slice %21 {offsets = [0, 0], sizes = [16, 8], strides = [1, 1]} : vector<32x32xf32> to vector<16x8xf32>
    %57 = vector.extract_strided_slice %21 {offsets = [0, 8], sizes = [16, 8], strides = [1, 1]} : vector<32x32xf32> to vector<16x8xf32>
    %58 = vector.extract_strided_slice %21 {offsets = [0, 16], sizes = [16, 8], strides = [1, 1]} : vector<32x32xf32> to vector<16x8xf32>
    %59 = vector.extract_strided_slice %21 {offsets = [0, 24], sizes = [16, 8], strides = [1, 1]} : vector<32x32xf32> to vector<16x8xf32>
    %60 = vector.extract_strided_slice %21 {offsets = [16, 0], sizes = [16, 8], strides = [1, 1]} : vector<32x32xf32> to vector<16x8xf32>
    %61 = vector.extract_strided_slice %21 {offsets = [16, 8], sizes = [16, 8], strides = [1, 1]} : vector<32x32xf32> to vector<16x8xf32>
    %62 = vector.extract_strided_slice %21 {offsets = [16, 16], sizes = [16, 8], strides = [1, 1]} : vector<32x32xf32> to vector<16x8xf32>
    %63 = vector.extract_strided_slice %21 {offsets = [16, 24], sizes = [16, 8], strides = [1, 1]} : vector<32x32xf32> to vector<16x8xf32>
    %64 = vector.shape_cast %56 : vector<16x8xf32> to vector<1x16x8xf32>
    %65 = vector.shape_cast %57 : vector<16x8xf32> to vector<1x16x8xf32>
    %66 = vector.shape_cast %58 : vector<16x8xf32> to vector<1x16x8xf32>
    %67 = vector.shape_cast %59 : vector<16x8xf32> to vector<1x16x8xf32>
    %68 = vector.shape_cast %60 : vector<16x8xf32> to vector<1x16x8xf32>
    %69 = vector.shape_cast %61 : vector<16x8xf32> to vector<1x16x8xf32>
    %70 = vector.shape_cast %62 : vector<16x8xf32> to vector<1x16x8xf32>
    %71 = vector.shape_cast %63 : vector<16x8xf32> to vector<1x16x8xf32>
    %72 = tpu.concatenate %64, %65, %66, %67, %68, %69, %70, %71 in 0 : vector<1x16x8xf32>, vector<1x16x8xf32>, vector<1x16x8xf32>, vector<1x16x8xf32>, vector<1x16x8xf32>, vector<1x16x8xf32>, vector<1x16x8xf32>, vector<1x16x8xf32> -> vector<8x16x8xf32>
    "tpu.trace_start"() <{level = 10 : i32, message = "gqd,gkd->gqk"}> : () -> ()
    %cst_9 = arith.constant dense<0.000000e+00> : vector<8x16x16xf32>
    %73 = tpu.matmul %38, %55, %cst_9 {dimension_numbers = #tpu.dot_dimension_numbers<[2], [2], [1], [1], [0, 0, 0, 1, 1, 1], [0], [0]>} : vector<8x16x8xf32>, vector<8x16x8xf32>, vector<8x16x16xf32> -> vector<8x16x16xf32>
    "tpu.trace_stop"() : () -> ()
    %cst_10 = arith.constant dense<0xFF800000> : vector<8x16xf32>
    %74 = vector.multi_reduction <maximumf>, %73, %cst_10 [2] : vector<8x16x16xf32> to vector<8x16xf32>
    %75 = vector.shape_cast %74 : vector<8x16xf32> to vector<8x16x1xf32>
    %76 = vector.broadcast %75 : vector<8x16x1xf32> to vector<8x16x16xf32>
    %77 = arith.subf %73, %76 : vector<8x16x16xf32>
    %78 = math.exp %77 : vector<8x16x16xf32>
    %cst_11 = arith.constant dense<0.000000e+00> : vector<8x16xf32>
    %79 = vector.multi_reduction <add>, %78, %cst_11 [2] : vector<8x16x16xf32> to vector<8x16xf32>
    %80 = vector.shape_cast %79 : vector<8x16xf32> to vector<8x16x1xf32>
    %81 = tpu.reciprocal %80 {approx = true} : vector<8x16x1xf32> -> vector<8x16x1xf32>
    %82 = vector.broadcast %81 : vector<8x16x1xf32> to vector<8x16x16xf32>
    %83 = arith.mulf %78, %82 : vector<8x16x16xf32>
    "tpu.trace_start"() <{level = 10 : i32, message = "gqk,gkd->gqd"}> : () -> ()
    %cst_12 = arith.constant dense<0.000000e+00> : vector<8x16x8xf32>
    %84 = tpu.matmul %83, %72, %cst_12 {dimension_numbers = #tpu.dot_dimension_numbers<[2], [1], [1], [2], [0, 0, 0, 1, 1, 2], [0], [0]>} : vector<8x16x16xf32>, vector<8x16x8xf32>, vector<8x16x8xf32> -> vector<8x16x8xf32>
    "tpu.trace_stop"() : () -> ()
    %85 = vector.extract_strided_slice %84 {offsets = [0, 0, 0], sizes = [1, 16, 8], strides = [1, 1, 1]} : vector<8x16x8xf32> to vector<1x16x8xf32>
    %86 = vector.shape_cast %85 : vector<1x16x8xf32> to vector<16x8xf32>
    %87 = vector.extract_strided_slice %84 {offsets = [1, 0, 0], sizes = [1, 16, 8], strides = [1, 1, 1]} : vector<8x16x8xf32> to vector<1x16x8xf32>
    %88 = vector.shape_cast %87 : vector<1x16x8xf32> to vector<16x8xf32>
    %89 = vector.extract_strided_slice %84 {offsets = [2, 0, 0], sizes = [1, 16, 8], strides = [1, 1, 1]} : vector<8x16x8xf32> to vector<1x16x8xf32>
    %90 = vector.shape_cast %89 : vector<1x16x8xf32> to vector<16x8xf32>
    %91 = vector.extract_strided_slice %84 {offsets = [3, 0, 0], sizes = [1, 16, 8], strides = [1, 1, 1]} : vector<8x16x8xf32> to vector<1x16x8xf32>
    %92 = vector.shape_cast %91 : vector<1x16x8xf32> to vector<16x8xf32>
    %93 = tpu.concatenate %86, %88, %90, %92 in 1 : vector<16x8xf32>, vector<16x8xf32>, vector<16x8xf32>, vector<16x8xf32> -> vector<16x32xf32>
    %94 = vector.extract_strided_slice %84 {offsets = [4, 0, 0], sizes = [1, 16, 8], strides = [1, 1, 1]} : vector<8x16x8xf32> to vector<1x16x8xf32>
    %95 = vector.shape_cast %94 : vector<1x16x8xf32> to vector<16x8xf32>
    %96 = vector.extract_strided_slice %84 {offsets = [5, 0, 0], sizes = [1, 16, 8], strides = [1, 1, 1]} : vector<8x16x8xf32> to vector<1x16x8xf32>
    %97 = vector.shape_cast %96 : vector<1x16x8xf32> to vector<16x8xf32>
    %98 = vector.extract_strided_slice %84 {offsets = [6, 0, 0], sizes = [1, 16, 8], strides = [1, 1, 1]} : vector<8x16x8xf32> to vector<1x16x8xf32>
    %99 = vector.shape_cast %98 : vector<1x16x8xf32> to vector<16x8xf32>
    %100 = vector.extract_strided_slice %84 {offsets = [7, 0, 0], sizes = [1, 16, 8], strides = [1, 1, 1]} : vector<8x16x8xf32> to vector<1x16x8xf32>
    %101 = vector.shape_cast %100 : vector<1x16x8xf32> to vector<16x8xf32>
    %102 = tpu.concatenate %95, %97, %99, %101 in 1 : vector<16x8xf32>, vector<16x8xf32>, vector<16x8xf32>, vector<16x8xf32> -> vector<16x32xf32>
    %103 = tpu.concatenate %93, %102 in 0 : vector<16x32xf32>, vector<16x32xf32> -> vector<32x32xf32>
    %c0_13 = arith.constant 0 : index
    %c0_14 = arith.constant 0 : index
    %104 = vector.load %arg8[%c0_13, %c0_14] : memref<4x64xf32, #tpu.memory_space<vmem>>, vector<4x64xf32>
    %105 = vector.extract_strided_slice %104 {offsets = [0, 0], sizes = [1, 64], strides = [1, 1]} : vector<4x64xf32> to vector<1x64xf32>
    %106 = vector.shape_cast %105 : vector<1x64xf32> to vector<64xf32>
    %107 = vector.extract_strided_slice %104 {offsets = [1, 0], sizes = [1, 64], strides = [1, 1]} : vector<4x64xf32> to vector<1x64xf32>
    %108 = vector.shape_cast %107 : vector<1x64xf32> to vector<64xf32>
    %109 = vector.extract_strided_slice %104 {offsets = [2, 0], sizes = [1, 64], strides = [1, 1]} : vector<4x64xf32> to vector<1x64xf32>
    %110 = vector.shape_cast %109 : vector<1x64xf32> to vector<64xf32>
    %111 = vector.extract_strided_slice %104 {offsets = [3, 0], sizes = [1, 32], strides = [1, 1]} : vector<4x64xf32> to vector<1x32xf32>
    %112 = vector.shape_cast %111 : vector<1x32xf32> to vector<32xf32>
    %c0_15 = arith.constant 0 : index
    %c0_16 = arith.constant 0 : index
    %113 = vector.load %arg5[%c0_15, %c0_16] : memref<32x64xf32, #tpu.memory_space<vmem>>, vector<32x64xf32>
    %cst_17 = arith.constant dense<0.000000e+00> : vector<32x64xf32>
    %114 = tpu.matmul %1, %113, %cst_17 {dimension_numbers = #tpu.dot_dimension_numbers<[1], [0], [0], [1], [0, 0, 1, 1], [], []>} : vector<32x32xf32>, vector<32x64xf32>, vector<32x64xf32> -> vector<32x64xf32>
    %c0_18 = arith.constant 0 : index
    %c0_19 = arith.constant 0 : index
    %115 = vector.load %arg6[%c0_18, %c0_19] : memref<32x64xf32, #tpu.memory_space<vmem>>, vector<32x64xf32>
    %cst_20 = arith.constant dense<0.000000e+00> : vector<32x64xf32>
    %116 = tpu.matmul %103, %115, %cst_20 {dimension_numbers = #tpu.dot_dimension_numbers<[1], [0], [0], [1], [0, 0, 1, 1], [], []>} : vector<32x32xf32>, vector<32x64xf32>, vector<32x64xf32> -> vector<32x64xf32>
    %117 = arith.addf %114, %116 : vector<32x64xf32>
    %118 = vector.shape_cast %106 : vector<64xf32> to vector<1x64xf32>
    %119 = vector.broadcast %118 : vector<1x64xf32> to vector<32x64xf32>
    %120 = arith.addf %117, %119 : vector<32x64xf32>
    %cst_21 = arith.constant dense<0.000000e+00> : vector<32xf32>
    %121 = vector.multi_reduction <add>, %120, %cst_21 [1] : vector<32x64xf32> to vector<32xf32>
    %122 = vector.shape_cast %121 : vector<32xf32> to vector<32x1xf32>
    %cst_22 = arith.constant 6.400000e+01 : f32
    %123 = vector.broadcast %cst_22 : f32 to vector<32x1xf32>
    %124 = arith.divf %122, %123 : vector<32x1xf32>
    %125 = vector.broadcast %124 : vector<32x1xf32> to vector<32x64xf32>
    %126 = arith.subf %120, %125 : vector<32x64xf32>
    %127 = arith.mulf %126, %126 : vector<32x64xf32>
    %cst_23 = arith.constant dense<0.000000e+00> : vector<32xf32>
    %128 = vector.multi_reduction <add>, %127, %cst_23 [1] : vector<32x64xf32> to vector<32xf32>
    %129 = vector.shape_cast %128 : vector<32xf32> to vector<32x1xf32>
    %cst_24 = arith.constant 6.400000e+01 : f32
    %130 = vector.broadcast %cst_24 : f32 to vector<32x1xf32>
    %131 = arith.divf %129, %130 : vector<32x1xf32>
    %132 = vector.broadcast %124 : vector<32x1xf32> to vector<32x64xf32>
    %133 = arith.subf %120, %132 : vector<32x64xf32>
    %cst_25 = arith.constant 9.99999974E-6 : f32
    %134 = vector.broadcast %cst_25 : f32 to vector<32x1xf32>
    %135 = arith.addf %131, %134 : vector<32x1xf32>
    %136 = math.rsqrt %135 : vector<32x1xf32>
    %137 = vector.broadcast %136 : vector<32x1xf32> to vector<32x64xf32>
    %138 = arith.mulf %133, %137 : vector<32x64xf32>
    %139 = vector.shape_cast %108 : vector<64xf32> to vector<1x64xf32>
    %140 = vector.broadcast %139 : vector<1x64xf32> to vector<32x64xf32>
    %141 = arith.mulf %138, %140 : vector<32x64xf32>
    %142 = vector.shape_cast %110 : vector<64xf32> to vector<1x64xf32>
    %143 = vector.broadcast %142 : vector<1x64xf32> to vector<32x64xf32>
    %144 = arith.addf %141, %143 : vector<32x64xf32>
    %cst_26 = arith.constant 5.000000e-01 : f32
    %145 = vector.broadcast %cst_26 : f32 to vector<32x64xf32>
    %146 = arith.mulf %145, %144 : vector<32x64xf32>
    %cst_27 = arith.constant 4.471500e-02 : f32
    %147 = vector.broadcast %cst_27 : f32 to vector<32x64xf32>
    %148 = arith.mulf %147, %144 : vector<32x64xf32>
    %149 = arith.mulf %148, %144 : vector<32x64xf32>
    %150 = arith.mulf %149, %144 : vector<32x64xf32>
    %151 = arith.addf %144, %150 : vector<32x64xf32>
    %cst_28 = arith.constant 0.797884583 : f32
    %152 = vector.broadcast %cst_28 : f32 to vector<32x64xf32>
    %153 = arith.mulf %152, %151 : vector<32x64xf32>
    %154 = math.tanh %153 : vector<32x64xf32>
    %cst_29 = arith.constant 1.000000e+00 : f32
    %155 = vector.broadcast %cst_29 : f32 to vector<32x64xf32>
    %156 = arith.addf %155, %154 : vector<32x64xf32>
    %157 = arith.mulf %146, %156 : vector<32x64xf32>
    %c0_30 = arith.constant 0 : index
    %c0_31 = arith.constant 0 : index
    %158 = vector.load %arg7[%c0_30, %c0_31] : memref<64x32xf32, #tpu.memory_space<vmem>>, vector<64x32xf32>
    %cst_32 = arith.constant dense<0.000000e+00> : vector<32x32xf32>
    %159 = tpu.matmul %157, %158, %cst_32 {dimension_numbers = #tpu.dot_dimension_numbers<[1], [0], [0], [1], [0, 0, 1, 1], [], []>} : vector<32x64xf32>, vector<64x32xf32>, vector<32x32xf32> -> vector<32x32xf32>
    %160 = arith.addf %1, %159 : vector<32x32xf32>
    %161 = vector.shape_cast %112 : vector<32xf32> to vector<1x32xf32>
    %162 = vector.broadcast %161 : vector<1x32xf32> to vector<32x32xf32>
    %163 = arith.addf %160, %162 : vector<32x32xf32>
    %164 = vector.shape_cast %163 : vector<32x32xf32> to vector<2x16x32xf32>
    %c0_33 = arith.constant 0 : index
    %c0_34 = arith.constant 0 : index
    %c0_35 = arith.constant 0 : index
    %165 = vector.load %arg9[%c0_33, %c0_34, %c0_35] : memref<2x16x32xf32, #tpu.memory_space<vmem>>, vector<2x16x32xf32>
    tpu.vector_store %arg9[%c0_33, %c0_34, %c0_35], %164 {strides = array<i32>} : memref<2x16x32xf32, #tpu.memory_space<vmem>>, vector<2x16x32xf32>,
    return
  }
  func.func @transform_0(%arg0: i32) -> (i32, i32, i32) {
    %c0_i32 = arith.constant 0 : i32
    %c0_i32_0 = arith.constant 0 : i32
    %c0_i32_1 = arith.constant 0 : i32
    return %arg0, %c0_i32, %c0_i32_0 : i32, i32, i32
  }
  func.func @transform_1(%arg0: i32) -> (i32, i32, i32) {
    %c0_i32 = arith.constant 0 : i32
    %c0_i32_0 = arith.constant 0 : i32
    %c0_i32_1 = arith.constant 0 : i32
    return %arg0, %c0_i32, %c0_i32_0 : i32, i32, i32
  }
  func.func @transform_2(%arg0: i32) -> (i32, i32) {
    %c0_i32 = arith.constant 0 : i32
    %c0_i32_0 = arith.constant 0 : i32
    %c0_i32_1 = arith.constant 0 : i32
    return %c0_i32, %c0_i32_0 : i32, i32
  }
  func.func @transform_3(%arg0: i32) -> (i32, i32) {
    %c0_i32 = arith.constant 0 : i32
    %c0_i32_0 = arith.constant 0 : i32
    %c0_i32_1 = arith.constant 0 : i32
    return %c0_i32, %c0_i32_0 : i32, i32
  }
  func.func @transform_4(%arg0: i32) -> (i32, i32) {
    %c0_i32 = arith.constant 0 : i32
    %c0_i32_0 = arith.constant 0 : i32
    %c0_i32_1 = arith.constant 0 : i32
    return %c0_i32, %c0_i32_0 : i32, i32
  }
  func.func @transform_5(%arg0: i32) -> (i32, i32) {
    %c0_i32 = arith.constant 0 : i32
    %c0_i32_0 = arith.constant 0 : i32
    %c0_i32_1 = arith.constant 0 : i32
    return %c0_i32, %c0_i32_0 : i32, i32
  }
  func.func @transform_6(%arg0: i32) -> (i32, i32) {
    %c0_i32 = arith.constant 0 : i32
    %c0_i32_0 = arith.constant 0 : i32
    %c0_i32_1 = arith.constant 0 : i32
    return %c0_i32, %c0_i32_0 : i32, i32
  }
  func.func @transform_7(%arg0: i32) -> (i32, i32) {
    %c0_i32 = arith.constant 0 : i32
    %c0_i32_0 = arith.constant 0 : i32
    %c0_i32_1 = arith.constant 0 : i32
    return %c0_i32, %c0_i32_0 : i32, i32
  }
  func.func @transform_8(%arg0: i32) -> (i32, i32, i32) {
    %c0_i32 = arith.constant 0 : i32
    %c0_i32_0 = arith.constant 0 : i32
    %c0_i32_1 = arith.constant 0 : i32
    return %arg0, %c0_i32, %c0_i32_0 : i32, i32, i32
  }
}

</mosaic_0001>

<bundles_post_ra>
// kernel: tpu_custom_call.1
= control target key start
LH: loop header
LB: loop body
LE: loop exit
PB: predicated region body
PF: predicated region fallthrough
CT: control target
= control target key end

     0   :  { %13 = vsyncpa [#allocation3], 0  ;;  %s3702_s0 = inlined_call_operand.vmem [shape: f32[2,16,32], index: 0, kind: input, shape index: {}]   ;;  %s3703_s1 = inlined_call_operand.hbm [shape: f32[2,16,64], index: 1, kind: input, shape index: {}]   ;;  %s3704_s2 = inlined_call_operand.vmem [shape: f32[32,160], index: 2, kind: input, shape index: {}]   ;;  %s3705_s3 = inlined_call_operand.vmem [shape: f32[1,160], index: 3, kind: input, shape index: {}]   ;;  %s3706_s4 = inlined_call_operand.hbm [shape: f32[32,64], index: 4, kind: input, shape index: {}]   ;;  %s3707_s5 = inlined_call_operand.hbm [shape: f32[32,64], index: 5, kind: input, shape index: {}]   ;;  %s3708_s6 = inlined_call_operand.vmem [shape: f32[64,32], index: 6, kind: input, shape index: {}]   ;;  %s3709_s7 = inlined_call_operand.vmem [shape: f32[4,64], index: 7, kind: input, shape index: {}]   ;;  %s3710_s8 = inlined_call_operand.hbm [shape: f32[2,16,32], index: 8, kind: output, shape index: {}]  }
   0x1   :  { %14 = vsyncpa [#allocation6], 0 }
   0x2   :  { %15 = vsyncpa [#allocation4], 0  ;;  %s3122_s27 = smov [#allocation5]   ;;  %s3123_s29 = smov [#allocation2]  }
   0x3   :  { %s39_s28 = sshll.u32 %s3122_s27, 4  ;;  %s23_s30 = sshll.u32 %s3123_s29, 4  ;;  %s40_s28 = int_to_ptr.vmem [resolvable:$true] %s39_s28  ;;  %s3181_s30 = int_to_ptr.vmem [resolvable:$true] %s23_s30 }
   0x4   :  { %s3028_s11 = scalar_lea.hbm %s3706_s4, 512 }
   0x5   :  { %p3029_p0 = scmp.ne.s32.totalorder %s3706_s4, %s3028_s11  ;;  %p3032_p1 = scmp.lt.u32.totalorder %s3028_s11, %s3706_s4 }
   0x7   :  { %p3034_p2 = pnand %p3032_p1, %p3029_p0 }
   0x9   :  { %3037 = shalt.err (!%p3034_p2)
}
   0xa   :  { %s3038_s16 = scalar_lea.vmem %s40_s28, 512  ;;  %p3043_p4 = scmp.lt.s32.totalorder %s40_s28, %s40_s28 }
   0xb   :  { %p3039_p3 = scmp.ne.s32.totalorder %s40_s28, %s3038_s16  ;;  %p3044_p5 = scmp.lt.s32.totalorder %s3038_s16, %s3038_s16 }
   0xd   :  { %p3045_p6 = por %p3044_p5, %p3043_p4 }
   0xf   :  { %p3046_p7 = pnand %p3045_p6, %p3039_p3 }
  0x11   :  { %3049 = shalt.err (!%p3046_p7)
}
  0x12   :  { %s3124_s17 = smov 128   ;;  %s3125_s18 = smov 8  }
  0x13   :  { %45 = dma.hbm_to_vmem [thread:$0]  %s3706_s4, 512, %s40_s28, [#allocation6], %s3124_s17, %s3124_s17, %s3125_s18  }
  0x14   :  { %s3050_s23 = scalar_lea.hbm %s3703_s1, 512 }
  0x15   :  { %p3051_p8 = scmp.ne.s32.totalorder %s3703_s1, %s3050_s23  ;;  %p3054_p9 = scmp.lt.u32.totalorder %s3050_s23, %s3703_s1 }
  0x17   :  { %p3056_p10 = pnand %p3054_p9, %p3051_p8 }
  0x19   :  { %3059 = shalt.err (!%p3056_p10)
}
  0x1a   :  { %s3060_s29 = scalar_lea.vmem %s3181_s30, 512  ;;  %p3065_p12 = scmp.lt.s32.totalorder %s3181_s30, %s3181_s30 }
  0x1b   :  { %p3061_p11 = scmp.ne.s32.totalorder %s3181_s30, %s3060_s29  ;;  %p3066_p13 = scmp.lt.s32.totalorder %s3060_s29, %s3060_s29 }
  0x1d   :  { %p3067_p0 = por %p3066_p13, %p3065_p12 }
  0x1f   :  { %p3068_p1 = pnand %p3067_p0, %p3061_p11 }
  0x21   :  { %3071 = shalt.err (!%p3068_p1)
}
  0x22   :  { %29 = dma.hbm_to_vmem [thread:$0]  %s3703_s1, 512, %s3181_s30, [#allocation3], %s3124_s17, %s3124_s17, %s3125_s18  }
  0x23   :  { %s3126_s9 = smov [#allocation7]   ;;  %s3072_s13 = scalar_lea.hbm %s3707_s5, 512 }
  0x24   :  { %s51_s10 = sshll.u32 %s3126_s9, 4  ;;  %p3073_p2 = scmp.ne.s32.totalorder %s3707_s5, %s3072_s13  ;;  %s52_s10 = int_to_ptr.vmem [resolvable:$true] %s51_s10 }
  0x25   :  { %p3076_p3 = scmp.lt.u32.totalorder %s3072_s13, %s3707_s5 }
  0x27   :  { %p3078_p4 = pnand %p3076_p3, %p3073_p2 }
  0x29   :  { %3081 = shalt.err (!%p3078_p4)
}
  0x2a   :  { %s3082_s20 = scalar_lea.vmem %s52_s10, 512  ;;  %p3087_p6 = scmp.lt.s32.totalorder %s52_s10, %s52_s10 }
  0x2b   :  { %p3083_p5 = scmp.ne.s32.totalorder %s52_s10, %s3082_s20  ;;  %p3088_p7 = scmp.lt.s32.totalorder %s3082_s20, %s3082_s20 }
  0x2d   :  { %p3089_p8 = por %p3088_p7, %p3087_p6 }
  0x2f   :  { %p3090_p9 = pnand %p3089_p8, %p3083_p5 }
  0x31   :  { %3093 = shalt.err (!%p3090_p9)
}
  0x32   :  { %57 = dma.hbm_to_vmem [thread:$0]  %s3707_s5, 512, %s52_s10, [#allocation6], %s3124_s17, %s3124_s17, %s3125_s18  }
  0x33   :  { %3116 = dma.done.wait [#allocation3], 512  }
  0x34   :  { %3117 = vsyncadd [#allocation3], 4294966784 }
  0x35   :  { %3118 = dma.done.wait [#allocation6], 1024  }
  0x36   :  { %3119 = vsyncadd [#allocation6], 4294966272  ;;  %v3127_v0 = vmov 0.0   ;;  %v80_v1 = vld [vmem:[%s3704_s2 + $0x8] sm:$0xff]  ;;  %v82_v2 = vld [vmem:[%s3704_s2 + $0x18] sm:$0xff]  ;;  %s3128_s14 = smov 64   ;;  %v89_v21 = vlaneseq }
  0x37   :  { %176 = vmatprep.mubr.f32.mxu0 %v3127_v0  ;;  %v79_v3 = vld [vmem:[%s3704_s2] sm:$0xff]  ;;  %v2706_v4 = vpack.c.bf16 %v82_v2, %v80_v1  ;;  %v81_v5 = vld [vmem:[%s3704_s2 + $0x10] sm:$0xff]  ;;  %v84_v6 = vld [vmem:[%s3704_s2 + $0x28] sm:$0xff]  ;;  %vm99_vm0 = vcmask 261120   ;;  %s3129_s24 = smov 96   ;;  %s3131_s25 = smov 120  }
  0x38   :  { %v86_v7 = vld [vmem:[%s3704_s2 + $0x38] sm:$0xff]  ;;  %v2708_v8 = vpack.c.bf16 %v81_v5, %v79_v3  ;;  %v83_v10 = vld [vmem:[%s3704_s2 + $0x20] sm:$0xff]  ;;  %v85_v11 = vld [vmem:[%s3704_s2 + $0x30] sm:$0xff]  ;;  %v3289_v22 = vshrl.u32 %v89_v21, 7  ;;  %s3132_s26 = smov 104   ;;  %vm365_vm1 = vcmask 64512  }
  0x39   :  { %v2710_v9 = vpack.c.bf16 %v86_v7, %v84_v6  ;;  %2707 = vmatprep.subr.bf16.mxu0 %v2706_v4  ;;  %v2712_v12 = vpack.c.bf16 %v85_v11, %v83_v10  ;;  %v3257_v13 = vld [vmem:[#allocation2] sm:$0xff]  ;;  %v3259_v14 = vld [vmem:[#allocation2 + $0x10] sm:$0xff]  ;;  %v3263_v15 = vld [vmem:[#allocation2 + $0x8] sm:$0xff]  ;;  %vm1058_vm3 = vcmask 130048   ;;  %s3133_s5 = smov 16   ;;  %s3134_s27 = smov 24  }
  0x3a   :  { %2709 = vmatpush1.bf16.msra.mxu0 %v2708_v8  ;;  %229 = vrot.lane.b32.xlu0 %v3257_v13, %s3128_s14  ;;  %v3267_v16 = vld [vmem:[#allocation2 + $0x18] sm:$0xff]  ;;  %v71_v17 = vld [vmem:[%s3702_s0] sm:$0xff]  ;;  %v72_v18 = vld [vmem:[%s3702_s0 + $0x8] sm:$0xff]  ;;  %v91_v23 = vsub.s32 0, %v3289_v22  ;;  %v95_v26 = vsub.s32 1, %v3289_v22  ;;  %vm1911_vm4 = vcmask 195584  }
  0x3b   :  { %2711 = vmatprep.subr.bf16.mxu0 %v2710_v9  ;;  %233 = vrot.lane.b32.xlu1 %v3259_v14, %s3128_s14  ;;  %v73_v19 = vld [vmem:[%s3702_s0 + $0x10] sm:$0xff]  ;;  %v74_v20 = vld [vmem:[%s3702_s0 + $0x18] sm:$0xff]  ;;  %v87_v24 = vld [vmem:[%s3705_s3] sm:$0x3]  ;;  %s3130_s3 = smov 112   ;;  %vm2143_vm5 = vcmask 523264  }
  0x3c   :  { %v92_v25 = vrot.slane %v87_v24, %v91_v23  ;;  %v96_v31 = vrot.slane %v87_v24, %v95_v26  ;;  %vm3338_vm2 = vmpackc.low %vm365_vm1, %vm365_vm1 }
  0x3e   :  { %2713 = vmatpush1.bf16.msra.mxu0 %v2712_v12  ;;  %231 = vrot.lane.b32.xlu0 %v3263_v15, %s3128_s14 }
  0x3f   :  { %235 = vrot.lane.b32.xlu1 %v3267_v16, %s3128_s14 }
  0x41   :  { %2388 = vmatmul.mubr.msk.f32.vlgmr.msra.gmra.mrb[0].mxu0 %vm99_vm0, %v71_v17 }
  0x42   :  { %182 = vmatprep.mubr.f32.mxu0 %v3127_v0 }
  0x45   :  { %2389 = vmatmul.mubr.msk.f32.gmra.mrb[2].mxu0 %vm99_vm0, %v72_v18 }
  0x46   :  { %188 = vmatprep.mubr.f32.mxu0 %v3127_v0 }
  0x49   :  { %2390 = vmatmul.mubr.msk.f32.gmra.mrb[4].mxu0 %vm99_vm0, %v73_v19 }
  0x4a   :  { %194 = vmatprep.mubr.f32.mxu0 %v3127_v0 }
  0x4d   :  { %2391 = vmatmul.mubr.msk.f32.gmra.mrb[6].mxu0 %vm99_vm0, %v74_v20 }
  0xac   :  { %v230_v27 = vpop.permute.xlu0 %229 }
  0xad   :  { %v234_v39 = vpop.permute.xlu1 %233 }
  0xb0   :  { %v232_v34 = vpop.permute.xlu0 %231 }
  0xb1   :  { %v236_v49 = vpop.permute.xlu1 %235 }
 0x114   :  { %v178_v28 = vpop.f32.mrb[0].mxu0 }
 0x115   :  { %v179_v29 = vadd.f32 %v178_v28, %v92_v25  ;;  %v180_v30 = vpop.f32.mrb[1].mxu0 }
 0x116   :  { %v181_v37 = vadd.f32 %v180_v30, %v96_v31 }
 0x117   :  { %v241_v32 = vmul.f32 %v230_v27, %v179_v29  ;;  %v201_v62 = vmul.f32 %v179_v29, %v3257_v13 }
 0x118   :  { %v184_v33 = vpop.f32.mrb[2].mxu0 }
 0x119   :  { %v185_v35 = vadd.f32 %v184_v33, %v92_v25  ;;  %v186_v36 = vpop.f32.mrb[3].mxu0  ;;  %249 = vrot.lane.b32.xlu0 %v241_v32, %s3129_s24 }
 0x11a   :  { %v187_v38 = vadd.f32 %v186_v36, %v96_v31 }
 0x11b   :  { %v242_v40 = vmul.f32 %v232_v34, %v185_v35  ;;  %v202_v2 = vmul.f32 %v185_v35, %v3263_v15 }
 0x11c   :  { %v190_v41 = vpop.f32.mrb[4].mxu0  ;;  %v3301_v42 = vpack.i.bf16 %v187_v38, %v181_v37  ;;  %v3303_v43 = vpack.c.bf16 %v187_v38, %v181_v37 }
 0x11d   :  { %v191_v44 = vadd.f32 %v190_v41, %v92_v25  ;;  %251 = vrot.lane.b32.xlu1 %v242_v40, %s3129_s24  ;;  %v192_v45 = vpop.f32.mrb[5].mxu0 }
 0x11e   :  { %v193_v46 = vadd.f32 %v192_v45, %v96_v31 }
 0x11f   :  { %v243_v47 = vmul.f32 %v234_v39, %v191_v44  ;;  %v203_v4 = vmul.f32 %v191_v44, %v3259_v14 }
 0x120   :  { %v196_v48 = vpop.f32.mrb[6].mxu0 }
 0x121   :  { %v197_v50 = vadd.f32 %v196_v48, %v92_v25  ;;  %253 = vrot.lane.b32.xlu0 %v243_v47, %s3129_s24  ;;  %v198_v51 = vpop.f32.mrb[7].mxu0 }
 0x122   :  { %v199_v52 = vadd.f32 %v198_v51, %v96_v31 }
 0x123   :  { %v244_v53 = vmul.f32 %v236_v49, %v197_v50  ;;  %v204_v5 = vmul.f32 %v197_v50, %v3267_v16 }
 0x124   :  { %v3307_v54 = vpack.i.bf16 %v199_v52, %v193_v46  ;;  %v3309_v55 = vpack.c.bf16 %v199_v52, %v193_v46 }
 0x125   :  { %255 = vrot.lane.b32.xlu1 %v244_v53, %s3129_s24 }
 0x18b   :  { %v250_v56 = vpop.permute.xlu0 %249 }
 0x18c   :  { %v261_v58 = vadd.f32 %v250_v56, %v241_v32 }
 0x18f   :  { %v252_v57 = vpop.permute.xlu1 %251 }
 0x190   :  { %v262_v59 = vadd.f32 %v252_v57, %v242_v40 }
 0x192   :  { %v2849_v60 = vpack.i.bf16 %v262_v59, %v261_v58 }
 0x193   :  { %v254_v61 = vpop.permute.xlu0 %253 }
 0x194   :  { %2850 = vrot.lane.b32.xlu1 %v2849_v60, %s3130_s3  ;;  %2845 = vrot.lane.b32.xlu0 %v2849_v60, %s3131_s25  ;;  %v263_v0 = vadd.f32 %v254_v61, %v243_v47 }
 0x197   :  { %v256_v63 = vpop.permute.xlu1 %255 }
 0x198   :  { %v264_v1 = vadd.f32 %v256_v63, %v244_v53  ;;  %2855 = vrot.lane.b32.xlu1 %v2849_v60, %s3132_s26  ;;  %209 = vrot.lane.b32.xlu0 %v201_v62, %s3129_s24 }
 0x19a   :  { %v2859_v3 = vpack.i.bf16 %v264_v1, %v263_v0 }
 0x19c   :  { %2860 = vrot.lane.b32.xlu1 %v2859_v3, %s3131_s25  ;;  %211 = vrot.lane.b32.xlu0 %v202_v2, %s3129_s24 }
 0x1a0   :  { %213 = vrot.lane.b32.xlu1 %v203_v4, %s3129_s24  ;;  %2865 = vrot.lane.b32.xlu0 %v2859_v3, %s3130_s3 }
 0x1a4   :  { %215 = vrot.lane.b32.xlu1 %v204_v5, %s3129_s24  ;;  %2870 = vrot.lane.b32.xlu0 %v2859_v3, %s3132_s26 }
 0x1a8   :  { %2875 = vrot.lane.b32.xlu0 %v2849_v60, %s3128_s14 }
 0x206   :  { %v2851_v6 = vpop.permute.xlu1 %2850  ;;  %v2846_v7 = vpop.permute.xlu0 %2845 }
 0x207   :  { %2880 = vrot.lane.b32.xlu1 %v2846_v7, %s3128_s14 }
 0x20a   :  { %v210_v8 = vpop.permute.xlu0 %209  ;;  %v2856_v10 = vpop.permute.xlu1 %2855 }
 0x20b   :  { %v221_v9 = vadd.f32 %v210_v8, %v201_v62 }
 0x20d   :  { %267 = vrot.lane.b32.xlu0 %v221_v9, %s3131_s25  ;;  %2548 = vmatprep.mubr.msk.f32.mxu1 %vm365_vm1, %v221_v9 }
 0x20e   :  { %v212_v11 = vpop.permute.xlu0 %211  ;;  %v2861_v14 = vpop.permute.xlu1 %2860 }
 0x20f   :  { %v222_v12 = vadd.f32 %v212_v11, %v202_v2 }
 0x211   :  { %2885 = vrot.lane.b32.xlu0 %v2851_v6, %s3128_s14  ;;  %269 = vrot.lane.b32.xlu1 %v222_v12, %s3131_s25 }
 0x212   :  { %v2866_v13 = vpop.permute.xlu0 %2865  ;;  %v214_v21 = vpop.permute.xlu1 %213 }
 0x213   :  { %v223_v24 = vadd.f32 %v214_v21, %v203_v4 }
 0x215   :  { %2890 = vrot.lane.b32.xlu0 %v2859_v3, %s3128_s14  ;;  %2895 = vrot.lane.b32.xlu1 %v2856_v10, %s3128_s14 }
 0x216   :  { %v2871_v15 = vpop.permute.xlu0 %2870  ;;  %v216_v25 = vpop.permute.xlu1 %215 }
 0x217   :  { %v224_v27 = vadd.f32 %v216_v25, %v204_v5 }
 0x219   :  { %271 = vrot.lane.b32.xlu0 %v221_v9, %s3130_s3  ;;  %273 = vrot.lane.b32.xlu1 %v222_v12, %s3130_s3 }
 0x21a   :  { %v2876_v16 = vpop.permute.xlu0 %2875 }
 0x21b   :  { %v2878_v17 = vunpack.i.h.bf16 %v2876_v16  ;;  %v2877_v18 = vunpack.i.l.bf16 %v2876_v16 }
 0x21d   :  { %275 = vrot.lane.b32.xlu0 %v221_v9, %s3132_s26  ;;  %2900 = vrot.lane.b32.xlu1 %v2861_v14, %s3128_s14  ;;  %v2714_v20 = vpack.c.bf16 %v2878_v17, %v2877_v18 }
 0x21f   :  { %2716 = vmatprep.subr.msk.bf16.mxu1 %vm3338_vm2, %v2714_v20 }
 0x220   :  { %2719 = vmatpush3.bf16.xpose.msk.msra.mxu1 %vm3338_vm2, %v2714_v20 }
 0x221   :  { %277 = vrot.lane.b32.xlu1 %v222_v12, %s3132_s26  ;;  %2905 = vrot.lane.b32.xlu0 %v2866_v13, %s3128_s14 }
 0x225   :  { %2910 = vrot.lane.b32.xlu1 %v2871_v15, %s3128_s14  ;;  %281 = vrot.lane.b32.xlu0 %v223_v24, %s3131_s25 }
 0x227   :  { %2549 = vmatmul.mubr.msk.f32.vlgmr.msra.gmra.mrb[0].mxu1 %vm365_vm1, %v222_v12 }
 0x229   :  { %283 = vrot.lane.b32.xlu1 %v224_v27, %s3131_s25  ;;  %285 = vrot.lane.b32.xlu0 %v223_v24, %s3130_s3 }
 0x22d   :  { %287 = vrot.lane.b32.xlu1 %v224_v27, %s3130_s3  ;;  %289 = vrot.lane.b32.xlu0 %v223_v24, %s3132_s26 }
 0x231   :  { %291 = vrot.lane.b32.xlu1 %v224_v27, %s3132_s26 }
 0x235   :  { %2915 = vrot.lane.b32.xlu1 %v3301_v42, %s3131_s25 }
 0x279   :  { %v2881_v28 = vpop.permute.xlu1 %2880 }
 0x27a   :  { %v2883_v29 = vunpack.i.h.bf16 %v2881_v28  ;;  %v2882_v30 = vunpack.i.l.bf16 %v2881_v28 }
 0x27c   :  { %v2720_v32 = vpack.c.bf16 %v2883_v29, %v2882_v30 }
 0x27e   :  { %2722 = vmatprep.subr.msk.bf16.mxu1 %vm3338_vm2, %v2720_v32 }
 0x27f   :  { %v268_v31 = vpop.permute.xlu0 %267  ;;  %2725 = vmatpush3.bf16.xpose.msk.msra.mxu1 %vm3338_vm2, %v2720_v32 }
 0x280   :  { %2555 = vmatprep.mubr.msk.f32.mxu1 %vm365_vm1, %v268_v31 }
 0x283   :  { %v270_v33 = vpop.permute.xlu1 %269  ;;  %v2886_v34 = vpop.permute.xlu0 %2885 }
 0x284   :  { %v2888_v35 = vunpack.i.h.bf16 %v2886_v34  ;;  %v2887_v36 = vunpack.i.l.bf16 %v2886_v34 }
 0x286   :  { %v2726_v37 = vpack.c.bf16 %v2888_v35, %v2887_v36  ;;  %2556 = vmatmul.mubr.msk.f32.vlgmr.msra.gmra.mrb[2].mxu1 %vm365_vm1, %v270_v33 }
 0x287   :  { %v2896_v38 = vpop.permute.xlu1 %2895  ;;  %v2891_v39 = vpop.permute.xlu0 %2890 }
 0x288   :  { %v2898_v40 = vunpack.i.h.bf16 %v2896_v38  ;;  %v2897_v41 = vunpack.i.l.bf16 %v2896_v38  ;;  %v2893_v44 = vunpack.i.h.bf16 %v2891_v39  ;;  %v2892_v45 = vunpack.i.l.bf16 %v2891_v39  ;;  %2728 = vmatprep.subr.msk.bf16.mxu0 %vm3338_vm2, %v2726_v37 }
 0x289   :  { %2731 = vmatpush3.bf16.xpose.msk.msra.mxu0 %vm3338_vm2, %v2726_v37 }
 0x28a   :  { %v2732_v46 = vpack.c.bf16 %v2898_v40, %v2897_v41  ;;  %v2738_v47 = vpack.c.bf16 %v2893_v44, %v2892_v45 }
 0x28b   :  { %v274_v48 = vpop.permute.xlu1 %273  ;;  %v272_v49 = vpop.permute.xlu0 %271 }
 0x28c   :  { %2562 = vmatprep.mubr.msk.f32.mxu0 %vm365_vm1, %v272_v49  ;;  %2734 = vmatprep.subr.msk.bf16.mxu1 %vm3338_vm2, %v2732_v46 }
 0x28d   :  { %2740 = vmatprep.subr.msk.bf16.mxu0 %vm3338_vm2, %v2738_v47  ;;  %2737 = vmatpush3.bf16.xpose.msk.msra.mxu1 %vm3338_vm2, %v2732_v46 }
 0x28f   :  { %v2901_v50 = vpop.permute.xlu1 %2900  ;;  %v276_v51 = vpop.permute.xlu0 %275 }
 0x290   :  { %v2903_v52 = vunpack.i.h.bf16 %v2901_v50  ;;  %v2902_v53 = vunpack.i.l.bf16 %v2901_v50  ;;  %2563 = vmatmul.mubr.msk.f32.vlgmr.msra.gmra.mrb[8].mxu0 %vm365_vm1, %v274_v48  ;;  %2569 = vmatprep.mubr.msk.f32.mxu1 %vm365_vm1, %v276_v51 }
 0x291   :  { %2743 = vmatpush3.bf16.xpose.msk.msra.mxu0 %vm3338_vm2, %v2738_v47  ;;  %2576 = vmatprep.mubr.msk.f32.mxu0 %vm365_vm1, %v223_v24 }
 0x292   :  { %v2744_v56 = vpack.c.bf16 %v2903_v52, %v2902_v53 }
 0x293   :  { %v278_v57 = vpop.permute.xlu1 %277  ;;  %v2906_v58 = vpop.permute.xlu0 %2905 }
 0x294   :  { %v2908_v59 = vunpack.i.h.bf16 %v2906_v58  ;;  %v2907_v60 = vunpack.i.l.bf16 %v2906_v58  ;;  %2570 = vmatmul.mubr.msk.f32.vlgmr.msra.gmra.mrb[4].mxu1 %vm365_vm1, %v278_v57  ;;  %2746 = vmatprep.subr.msk.bf16.mxu1 %vm3338_vm2, %v2744_v56 }
 0x295   :  { %2749 = vmatpush3.bf16.xpose.msk.msra.mxu1 %vm3338_vm2, %v2744_v56 }
 0x296   :  { %v2750_v61 = vpack.c.bf16 %v2908_v59, %v2907_v60 }
 0x297   :  { %v2911_v62 = vpop.permute.xlu1 %2910  ;;  %v282_v63 = vpop.permute.xlu0 %281 }
 0x298   :  { %v2913_v0 = vunpack.i.h.bf16 %v2911_v62  ;;  %v2912_v1 = vunpack.i.l.bf16 %v2911_v62  ;;  %2577 = vmatmul.mubr.msk.f32.vlgmr.msra.gmra.mrb[10].mxu0 %vm365_vm1, %v224_v27  ;;  %2583 = vmatprep.mubr.msk.f32.mxu1 %vm365_vm1, %v282_v63 }
 0x299   :  { %2752 = vmatprep.subr.msk.bf16.mxu0 %vm3338_vm2, %v2750_v61 }
 0x29a   :  { %v2756_v2 = vpack.c.bf16 %v2913_v0, %v2912_v1  ;;  %2755 = vmatpush3.bf16.xpose.msk.msra.mxu0 %vm3338_vm2, %v2750_v61 }
 0x29b   :  { %2763 = vmatprep.subr.bf16.mxu0 %v3303_v43  ;;  %v284_v3 = vpop.permute.xlu1 %283  ;;  %v286_v4 = vpop.permute.xlu0 %285 }
 0x29c   :  { %2584 = vmatmul.mubr.msk.f32.vlgmr.msra.gmra.mrb[6].mxu1 %vm365_vm1, %v284_v3  ;;  %2590 = vmatprep.mubr.msk.f32.mxu0 %vm365_vm1, %v286_v4 }
 0x29d   :  { %2758 = vmatprep.subr.msk.bf16.mxu1 %vm3338_vm2, %v2756_v2 }
 0x29e   :  { %2761 = vmatpush3.bf16.xpose.msk.msra.mxu1 %vm3338_vm2, %v2756_v2 }
 0x29f   :  { %v288_v5 = vpop.permute.xlu1 %287  ;;  %v290_v6 = vpop.permute.xlu0 %289 }
 0x2a0   :  { %2597 = vmatprep.mubr.msk.f32.mxu1 %vm365_vm1, %v290_v6 }
 0x2a1   :  { %2591 = vmatmul.mubr.msk.f32.vlgmr.msra.gmra.mrb[12].mxu0 %vm365_vm1, %v288_v5 }
 0x2a2   :  { %2765 = vmatpush3.bf16.msra.mxu0 %v3303_v43 }
 0x2a3   :  { %v292_v7 = vpop.permute.xlu1 %291 }
 0x2a5   :  { %2598 = vmatmul.mubr.msk.f32.vlgmr.msra.gmra.mrb[8].mxu1 %vm365_vm1, %v292_v7 }
 0x2a7   :  { %v2916_v8 = vpop.permute.xlu1 %2915 }
 0x2a8   :  { %v2918_v9 = vunpack.i.h.bf16 %v2916_v8  ;;  %v2917_v10 = vunpack.i.l.bf16 %v2916_v8 }
 0x2aa   :  { %v2766_v11 = vpack.c.bf16 %v2918_v9, %v2917_v10 }
 0x2ac   :  { %2767 = vmatprep.subr.bf16.mxu1 %v2766_v11 }
 0x2ad   :  { %2769 = vmatpush3.bf16.msra.mxu1 %v2766_v11 }
 0x2fa   :  { %v2550_v12 = vpop.f32.mrb[0].mxu1 }
 0x2fb   :  { %v440_v13 = vpop.f32.mrb[1].mxu1  ;;  %v1062_v14 = vsel %vm1058_vm3, %v2550_v12, -inf }
 0x2fc   :  { %1063 = vmax.xlane.f32.xlu1 %v1062_v14  ;;  %v1059_v15 = vsel %vm1058_vm3, %v440_v13, -inf }
 0x2fd   :  { %1060 = vmax.xlane.f32.xlu0 %v1059_v15 }
 0x359   :  { %v2557_v16 = vpop.f32.mrb[2].mxu1 }
 0x35a   :  { %v3406_v43 = vpop.f32.mrb[3].mxu1  ;;  %v1068_v17 = vsel %vm1058_vm3, %v2557_v16, -inf }
 0x35b   :  { %1069 = vmax.xlane.f32.xlu0 %v1068_v17  ;;  %v1065_v27 = vsel %vm1058_vm3, %v3406_v43, -inf }
 0x363   :  { %v2564_v18 = vpop.f32.mrb[8].mxu0 }
 0x364   :  { %v3409_v19 = vpop.f32.mrb[9].mxu0  ;;  %v1074_v20 = vsel %vm1058_vm3, %v2564_v18, -inf }
 0x365   :  { %1075 = vmax.xlane.f32.xlu0 %v1074_v20  ;;  %v1071_v21 = vsel %vm1058_vm3, %v3409_v19, -inf }
 0x366   :  { %1072 = vmax.xlane.f32.xlu1 %v1071_v21 }
 0x367   :  { %v3414_v24 = vpop.f32.mrb[4].mxu1 }
 0x368   :  { %v3416_v25 = vpop.f32.mrb[5].mxu1  ;;  %v1080_v31 = vsel %vm1058_vm3, %v3414_v24, -inf }
 0x369   :  { %1066 = vmax.xlane.f32.xlu0 %v1065_v27  ;;  %v1077_v28 = vsel %vm1058_vm3, %v3416_v25, -inf }
 0x36a   :  { %1078 = vmax.xlane.f32.xlu1 %v1077_v28 }
 0x36b   :  { %v3422_v29 = vpop.f32.mrb[10].mxu0 }
 0x36c   :  { %v3424_v30 = vpop.f32.mrb[11].mxu0  ;;  %v1086_v35 = vsel %vm1058_vm3, %v3422_v29, -inf }
 0x36d   :  { %1081 = vmax.xlane.f32.xlu0 %v1080_v31  ;;  %v1083_v32 = vsel %vm1058_vm3, %v3424_v30, -inf }
 0x36e   :  { %1084 = vmax.xlane.f32.xlu1 %v1083_v32 }
 0x36f   :  { %v3430_v33 = vpop.f32.mrb[6].mxu1 }
 0x370   :  { %v3432_v34 = vpop.f32.mrb[7].mxu1  ;;  %v1092_v38 = vsel %vm1058_vm3, %v3430_v33, -inf }
 0x371   :  { %1087 = vmax.xlane.f32.xlu0 %v1086_v35  ;;  %v1089_v36 = vsel %vm1058_vm3, %v3432_v34, -inf }
 0x372   :  { %1090 = vmax.xlane.f32.xlu1 %v1089_v36 }
 0x374   :  { %v3438_v37 = vpop.f32.mrb[12].mxu0 }
 0x375   :  { %v3442_v39 = vpop.f32.mrb[13].mxu0  ;;  %1093 = vmax.xlane.f32.xlu0 %v1092_v38  ;;  %v1098_v44 = vsel %vm1058_vm3, %v3438_v37, -inf }
 0x376   :  { %v1095_v40 = vsel %vm1058_vm3, %v3442_v39, -inf }
 0x377   :  { %1096 = vmax.xlane.f32.xlu1 %v1095_v40 }
 0x378   :  { %v3446_v41 = vpop.f32.mrb[8].mxu1 }
 0x379   :  { %v3450_v45 = vpop.f32.mrb[9].mxu1  ;;  %1099 = vmax.xlane.f32.xlu0 %v1098_v44  ;;  %v1104_v46 = vsel %vm1058_vm3, %v3446_v41, -inf }
 0x37a   :  { %v1101_v50 = vsel %vm1058_vm3, %v3450_v45, -inf }
 0x37d   :  { %1105 = vmax.xlane.f32.xlu0 %v1104_v46 }
 0x388   :  { %2925 = vrot.lane.b32.xlu1 %v3301_v42, %s3132_s26 }
 0x389   :  { %v1064_v47 = vpop.xlane.xlu1 %1063 }
 0x38a   :  { %v1108_v48 = vsub.f32 %v2550_v12, %v1064_v47  ;;  %v1061_v53 = vpop.xlane.xlu0 %1060 }
 0x38b   :  { %v1107_v56 = vsub.f32 %v440_v13, %v1061_v53 }
 0x38c   :  { %v1125_v49 = vmul.f32 1.442695, %v1108_v48 }
 0x38e   :  { %2944 = vpow2.f32 %v1125_v49 }
 0x393   :  { %2920 = vrot.lane.b32.xlu0 %v3301_v42, %s3130_s3  ;;  %v1123_v42 = vmul.f32 1.442695, %v1107_v56 }
 0x395   :  { %2946 = vpow2.f32 %v1123_v42 }
 0x398   :  { %v3460_v51 = vpop.eup %2944 }
 0x399   :  { %v1158_v52 = vsel %vm1058_vm3, %v3460_v51, 0.0 }
 0x39f   :  { %v3466_v57 = vpop.eup %2946 }
 0x3a0   :  { %v1155_v58 = vsel %vm1058_vm3, %v3466_v57, 0.0 }
 0x3ac   :  { %1102 = vmax.xlane.f32.xlu1 %v1101_v50 }
 0x3b2   :  { %1159 = vadd.xlane.f32.xlu0 %v1158_v52 }
 0x3bd   :  { %2930 = vrot.lane.b32.xlu1 %v3307_v54, %s3131_s25 }
 0x3e1   :  { %1156 = vadd.xlane.f32.xlu1 %v1155_v58 }
 0x3e8   :  { %v1070_v59 = vpop.xlane.xlu0 %1069 }
 0x3e9   :  { %v1110_v60 = vsub.f32 %v2557_v16, %v1070_v59 }
 0x3eb   :  { %v1129_v61 = vmul.f32 1.442695, %v1110_v60 }
 0x3ed   :  { %2948 = vpow2.f32 %v1129_v61 }
 0x3f2   :  { %v1076_v62 = vpop.xlane.xlu0 %1075 }
 0x3f3   :  { %v1112_v63 = vsub.f32 %v2564_v18, %v1076_v62  ;;  %v1073_v0 = vpop.xlane.xlu1 %1072 }
 0x3f4   :  { %v1111_v2 = vsub.f32 %v3409_v19, %v1073_v0 }
 0x3f5   :  { %v1133_v1 = vmul.f32 1.442695, %v1112_v63 }
 0x3f6   :  { %v1067_v3 = vpop.xlane.xlu0 %1066  ;;  %v1131_v6 = vmul.f32 1.442695, %v1111_v2 }
 0x3f7   :  { %2950 = vpow2.f32 %v1133_v1  ;;  %v1109_v4 = vsub.f32 %v3406_v43, %v1067_v3  ;;  %v1079_v5 = vpop.xlane.xlu1 %1078  ;;  %v3473_v10 = vpop.eup %2948 }
 0x3f8   :  { %v1113_v8 = vsub.f32 %v3416_v25, %v1079_v5  ;;  %v1164_v13 = vsel %vm1058_vm3, %v3473_v10, 0.0 }
 0x3f9   :  { %v1127_v7 = vmul.f32 1.442695, %v1109_v4  ;;  %1165 = vadd.xlane.f32.xlu0 %v1164_v13 }
 0x3fa   :  { %v1082_v9 = vpop.xlane.xlu0 %1081  ;;  %v1135_v14 = vmul.f32 1.442695, %v1113_v8 }
 0x3fb   :  { %2952 = vpow2.f32 %v1127_v7  ;;  %v1114_v11 = vsub.f32 %v3414_v24, %v1082_v9  ;;  %v1085_v12 = vpop.xlane.xlu1 %1084 }
 0x3fc   :  { %2954 = vpow2.f32 %v1131_v6  ;;  %v1115_v16 = vsub.f32 %v3424_v30, %v1085_v12 }
 0x3fd   :  { %v1137_v15 = vmul.f32 1.442695, %v1114_v11 }
 0x3fe   :  { %v1088_v43 = vpop.xlane.xlu0 %1087  ;;  %v1139_v21 = vmul.f32 1.442695, %v1115_v16 }
 0x3ff   :  { %2956 = vpow2.f32 %v1137_v15  ;;  %v1116_v17 = vsub.f32 %v3422_v29, %v1088_v43  ;;  %v1091_v18 = vpop.xlane.xlu1 %1090 }
 0x400   :  { %2958 = vpow2.f32 %v1135_v14  ;;  %v1117_v24 = vsub.f32 %v3432_v34, %v1091_v18 }
 0x401   :  { %v3480_v19 = vpop.eup %2950  ;;  %v1141_v20 = vmul.f32 1.442695, %v1116_v17 }
 0x402   :  { %v1094_v25 = vpop.xlane.xlu0 %1093  ;;  %v1170_v27 = vsel %vm1058_vm3, %v3480_v19, 0.0  ;;  %v1143_v32 = vmul.f32 1.442695, %v1117_v24 }
 0x403   :  { %2960 = vpow2.f32 %v1141_v20  ;;  %v1118_v28 = vsub.f32 %v3430_v33, %v1094_v25  ;;  %1171 = vadd.xlane.f32.xlu0 %v1170_v27 }
 0x404   :  { %v1097_v30 = vpop.xlane.xlu1 %1096  ;;  %2962 = vpow2.f32 %v1139_v21 }
 0x405   :  { %v3486_v31 = vpop.eup %2952  ;;  %v1145_v29 = vmul.f32 1.442695, %v1118_v28  ;;  %v1119_v35 = vsub.f32 %v3442_v39, %v1097_v30 }
 0x406   :  { %v1100_v36 = vpop.xlane.xlu0 %1099  ;;  %v1161_v34 = vsel %vm1058_vm3, %v3486_v31, 0.0  ;;  %v3491_v38 = vpop.eup %2954 }
 0x407   :  { %2964 = vpow2.f32 %v1145_v29  ;;  %v1120_v40 = vsub.f32 %v3438_v37, %v1100_v36  ;;  %1162 = vadd.xlane.f32.xlu1 %v1161_v34  ;;  %v1147_v49 = vmul.f32 1.442695, %v1119_v35  ;;  %v1167_v52 = vsel %vm1058_vm3, %v3491_v38, 0.0 }
 0x408   :  { %v2926_v33 = vpop.permute.xlu1 %2925  ;;  %2966 = vpow2.f32 %v1143_v32 }
 0x409   :  { %v3494_v44 = vpop.eup %2956  ;;  %v1149_v46 = vmul.f32 1.442695, %v1120_v40  ;;  %v2928_v47 = vunpack.i.h.bf16 %v2926_v33  ;;  %v2927_v48 = vunpack.i.l.bf16 %v2926_v33 }
 0x40a   :  { %v1106_v50 = vpop.xlane.xlu0 %1105  ;;  %v1176_v39 = vsel %vm1058_vm3, %v3494_v44, 0.0  ;;  %v3500_v53 = vpop.eup %2958 }
 0x40b   :  { %2968 = vpow2.f32 %v1149_v46  ;;  %v3502_v37 = vpack.c.bf16 %v2928_v47, %v2927_v48  ;;  %v1122_v56 = vsub.f32 %v3446_v41, %v1106_v50  ;;  %1177 = vadd.xlane.f32.xlu0 %v1176_v39  ;;  %1168 = vadd.xlane.f32.xlu1 %v1167_v52  ;;  %v1173_v61 = vsel %vm1058_vm3, %v3500_v53, 0.0 }
 0x40c   :  { %2970 = vpow2.f32 %v1147_v49 }
 0x40d   :  { %v3505_v42 = vpop.eup %2960  ;;  %v1153_v58 = vmul.f32 1.442695, %v1122_v56  ;;  %2775 = vmatprep.subr.bf16.mxu1 %v3502_v37 }
 0x40e   :  { %v2921_v59 = vpop.permute.xlu0 %2920  ;;  %v1182_v60 = vsel %vm1058_vm3, %v3505_v42, 0.0  ;;  %v3512_v41 = vpop.eup %2962 }
 0x40f   :  { %2972 = vpow2.f32 %v1153_v58  ;;  %v2923_v62 = vunpack.i.h.bf16 %v2921_v59  ;;  %v2922_v63 = vunpack.i.l.bf16 %v2921_v59  ;;  %1183 = vadd.xlane.f32.xlu0 %v1182_v60  ;;  %1174 = vadd.xlane.f32.xlu1 %v1173_v61  ;;  %v1179_v3 = vsel %vm1058_vm3, %v3512_v41, 0.0 }
 0x411   :  { %v3514_v0 = vpop.eup %2964  ;;  %v2770_v1 = vpack.c.bf16 %v2923_v62, %v2922_v63 }
 0x412   :  { %v1188_v2 = vsel %vm1058_vm3, %v3514_v0, 0.0  ;;  %v3520_v4 = vpop.eup %2966 }
 0x413   :  { %1189 = vadd.xlane.f32.xlu0 %v1188_v2  ;;  %2771 = vmatprep.subr.bf16.mxu0 %v2770_v1  ;;  %v1185_v7 = vsel %vm1058_vm3, %v3520_v4, 0.0 }
 0x414   :  { %1180 = vadd.xlane.f32.xlu1 %v1179_v3 }
 0x415   :  { %v3522_v5 = vpop.eup %2968 }
 0x416   :  { %v1194_v6 = vsel %vm1058_vm3, %v3522_v5, 0.0  ;;  %v3528_v8 = vpop.eup %2970 }
 0x417   :  { %1195 = vadd.xlane.f32.xlu0 %v1194_v6  ;;  %v1191_v12 = vsel %vm1058_vm3, %v3528_v8, 0.0 }
 0x418   :  { %1186 = vadd.xlane.f32.xlu1 %v1185_v7 }
 0x419   :  { %v3530_v9 = vpop.eup %2972 }
 0x41a   :  { %v1200_v11 = vsel %vm1058_vm3, %v3530_v9, 0.0 }
 0x41b   :  { %1201 = vadd.xlane.f32.xlu0 %v1200_v11 }
 0x41c   :  { %1192 = vadd.xlane.f32.xlu1 %v1191_v12 }
 0x431   :  { %2935 = vrot.lane.b32.xlu0 %v3307_v54, %s3130_s3 }
 0x439   :  { %v1103_v13 = vpop.xlane.xlu1 %1102 }
 0x43a   :  { %v1121_v14 = vsub.f32 %v3450_v45, %v1103_v13 }
 0x43c   :  { %v1151_v15 = vmul.f32 1.442695, %v1121_v14 }
 0x43d   :  { %v2931_v17 = vpop.permute.xlu1 %2930 }
 0x43e   :  { %2974 = vpow2.f32 %v1151_v15  ;;  %v2933_v36 = vunpack.i.h.bf16 %v2931_v17  ;;  %v2932_v34 = vunpack.i.l.bf16 %v2931_v17 }
 0x43f   :  { %v1160_v18 = vpop.xlane.xlu0 %1159 }
 0x440   :  { %2976 = vrcp.f32 %v1160_v18  ;;  %v2782_v49 = vpack.c.bf16 %v2933_v36, %v2932_v34 }
 0x448   :  { %v3539_v16 = vpop.eup %2974 }
 0x449   :  { %v1197_v43 = vsel %vm1058_vm3, %v3539_v16, 0.0 }
 0x44a   :  { %1198 = vadd.xlane.f32.xlu1 %v1197_v43  ;;  %v2977_v21 = vpop.eup %2976 }
 0x44b   :  { %v1220_v25 = vmul.f32 %v2977_v21, %v3460_v51  ;;  %v1949_v21 = vld [vmem:[#allocation7] sm:$0xff] }
 0x45b   :  { %2940 = vrot.lane.b32.xlu1 %v3307_v54, %s3132_s26 }
 0x46e   :  { %v1157_v20 = vpop.xlane.xlu1 %1156 }
 0x46f   :  { %2978 = vrcp.f32 %v1157_v20 }
 0x479   :  { %v2979_v24 = vpop.eup %2978 }
 0x47a   :  { %v1219_v45 = vmul.f32 %v2979_v24, %v3466_v57  ;;  %v1950_v24 = vld [vmem:[#allocation7 + $0x8] sm:$0xff] }
 0x47c   :  { %2604 = vmatprep.mubr.msk.f32.mxu0 %vm1058_vm3, %v1219_v45  ;;  %v2794_v45 = vpack.c.bf16 %v1950_v24, %v1949_v21 }
 0x47d   :  { %2605 = vmatmul.mubr.msk.f32.vlgmr.msra.gmra.mrb[14].mxu0 %vm1058_vm3, %v1220_v25  ;;  %v1951_v25 = vld [vmem:[#allocation7 + $0x10] sm:$0xff] }
 0x47e   :  { %2773 = vmatpush3.bf16.msra.mxu0 %v2770_v1 }
 0x47f   :  { %2779 = vmatprep.subr.bf16.mxu0 %v3309_v55 }
 0x486   :  { %v1166_v27 = vpop.xlane.xlu0 %1165 }
 0x487   :  { %2980 = vrcp.f32 %v1166_v27  ;;  %v1952_v27 = vld [vmem:[#allocation7 + $0x18] sm:$0xff] }
 0x490   :  { %v1172_v54 = vpop.xlane.xlu0 %1171 }
 0x491   :  { %v2981_v51 = vpop.eup %2980 }
 0x492   :  { %v1222_v46 = vmul.f32 %v2981_v51, %v3473_v10  ;;  %v1946_v51 = vld [vmem:[#allocation5 + $0x8] sm:$0xff] }
 0x494   :  { %v1163_v28 = vpop.xlane.xlu1 %1162 }
 0x495   :  { %2982 = vrcp.f32 %v1163_v28 }
 0x496   :  { %2984 = vrcp.f32 %v1172_v54  ;;  %v2798_v54 = vpack.c.bf16 %v1952_v27, %v1951_v25 }
 0x498   :  { %v1178_v30 = vpop.xlane.xlu0 %1177  ;;  %v1169_v29 = vpop.xlane.xlu1 %1168 }
 0x499   :  { %2986 = vrcp.f32 %v1169_v29 }
 0x49a   :  { %2988 = vrcp.f32 %v1178_v30 }
 0x49c   :  { %v1184_v32 = vpop.xlane.xlu0 %1183  ;;  %v1175_v57 = vpop.xlane.xlu1 %1174 }
 0x49d   :  { %2990 = vrcp.f32 %v1175_v57  ;;  %v1945_v57 = vld [vmem:[#allocation5] sm:$0xff] }
 0x49e   :  { %2992 = vrcp.f32 %v1184_v32 }
 0x49f   :  { %v2983_v35 = vpop.eup %2982 }
 0x4a0   :  { %v1190_v40 = vpop.xlane.xlu0 %1189  ;;  %v1221_v33 = vmul.f32 %v2983_v35, %v3486_v31  ;;  %v2985_v48 = vpop.eup %2984  ;;  %v2802_v35 = vpack.c.bf16 %v1946_v51, %v1945_v57 }
 0x4a1   :  { %v1181_v47 = vpop.xlane.xlu1 %1180  ;;  %v1224_v10 = vmul.f32 %v2985_v48, %v3480_v19 }
 0x4a2   :  { %2994 = vrcp.f32 %v1181_v47  ;;  %2611 = vmatprep.mubr.msk.f32.mxu1 %vm1058_vm3, %v1221_v33 }
 0x4a3   :  { %2612 = vmatmul.mubr.msk.f32.vlgmr.msra.gmra.mrb[10].mxu1 %vm1058_vm3, %v1222_v46  ;;  %v2987_v50 = vpop.eup %2986  ;;  %2996 = vrcp.f32 %v1190_v40 }
 0x4a4   :  { %2777 = vmatpush3.bf16.msra.mxu1 %v3502_v37  ;;  %v1196_v39 = vpop.xlane.xlu0 %1195  ;;  %v1223_v31 = vmul.f32 %v2987_v50, %v3491_v38  ;;  %v2989_v56 = vpop.eup %2988 }
 0x4a5   :  { %v1187_v52 = vpop.xlane.xlu1 %1186  ;;  %2783 = vmatprep.subr.bf16.mxu1 %v2782_v49  ;;  %v1226_v61 = vmul.f32 %v2989_v56, %v3494_v44  ;;  %v1948_v56 = vld [vmem:[#allocation5 + $0x18] sm:$0xff] }
 0x4a6   :  { %2998 = vrcp.f32 %v1187_v52  ;;  %2618 = vmatprep.mubr.msk.f32.mxu0 %vm1058_vm3, %v1223_v31 }
 0x4a7   :  { %v2991_v58 = vpop.eup %2990  ;;  %2619 = vmatmul.mubr.msk.f32.vlgmr.msra.gmra.mrb[16].mxu0 %vm1058_vm3, %v1224_v10  ;;  %3000 = vrcp.f32 %v1196_v39  ;;  %v1947_v10 = vld [vmem:[#allocation5 + $0x10] sm:$0xff] }
 0x4a8   :  { %v1202_v59 = vpop.xlane.xlu0 %1201  ;;  %2781 = vmatpush3.bf16.msra.mxu0 %v3309_v55  ;;  %v1225_v60 = vmul.f32 %v2991_v58, %v3500_v53  ;;  %v2993_v38 = vpop.eup %2992 }
 0x4a9   :  { %v1193_v37 = vpop.xlane.xlu1 %1192  ;;  %v1228_v55 = vmul.f32 %v2993_v38, %v3505_v42 }
 0x4aa   :  { %3002 = vrcp.f32 %v1193_v37  ;;  %2625 = vmatprep.mubr.msk.f32.mxu1 %vm1058_vm3, %v1225_v60 }
 0x4ab   :  { %2626 = vmatmul.mubr.msk.f32.vlgmr.msra.gmra.mrb[12].mxu1 %vm1058_vm3, %v1226_v61  ;;  %3004 = vrcp.f32 %v1202_v59 }
 0x4ac   :  { %v2995_v19 = vpop.eup %2994  ;;  %v2936_v62 = vpop.permute.xlu0 %2935  ;;  %2785 = vmatpush3.bf16.msra.mxu1 %v2782_v49 }
 0x4ad   :  { %v2938_v63 = vunpack.i.h.bf16 %v2936_v62  ;;  %v2937_v1 = vunpack.i.l.bf16 %v2936_v62  ;;  %v1227_v2 = vmul.f32 %v2995_v19, %v3512_v41  ;;  %v2997_v3 = vpop.eup %2996  ;;  %v2806_v62 = vpack.c.bf16 %v1948_v56, %v1947_v10  ;;  %v2250_v10 = vld [vmem:[%s3708_s6 + $0x8] sm:$0xff]  ;;  %v2251_v56 = vld [vmem:[%s3708_s6 + $0x10] sm:$0xff] }
 0x4ae   :  { %v1230_v7 = vmul.f32 %v2997_v3, %v3514_v0 }
 0x4af   :  { %v2786_v6 = vpack.c.bf16 %v2938_v63, %v2937_v1  ;;  %2632 = vmatprep.mubr.msk.f32.mxu0 %vm1058_vm3, %v1227_v2 }
 0x4b0   :  { %v2999_v44 = vpop.eup %2998  ;;  %2633 = vmatmul.mubr.msk.f32.vlgmr.msra.gmra.mrb[18].mxu0 %vm1058_vm3, %v1228_v55 }
 0x4b1   :  { %2787 = vmatprep.subr.bf16.mxu0 %v2786_v6  ;;  %v1229_v53 = vmul.f32 %v2999_v44, %v3520_v4  ;;  %v3001_v11 = vpop.eup %3000 }
 0x4b2   :  { %2789 = vmatpush3.bf16.msra.mxu0 %v2786_v6  ;;  %v1232_v41 = vmul.f32 %v3001_v11, %v3522_v5 }
 0x4b3   :  { %2639 = vmatprep.mubr.msk.f32.mxu1 %vm1058_vm3, %v1229_v53  ;;  %2795 = vmatprep.subr.bf16.mxu0 %v2794_v45 }
 0x4b4   :  { %v3003_v12 = vpop.eup %3002  ;;  %2640 = vmatmul.mubr.msk.f32.vlgmr.msra.gmra.mrb[14].mxu1 %vm1058_vm3, %v1230_v7 }
 0x4b5   :  { %v1231_v42 = vmul.f32 %v3003_v12, %v3528_v8  ;;  %v3005_v43 = vpop.eup %3004 }
 0x4b6   :  { %v1234_v8 = vmul.f32 %v3005_v43, %v3530_v9 }
 0x4b7   :  { %2646 = vmatprep.mubr.msk.f32.mxu0 %vm1058_vm3, %v1231_v42 }
 0x4b8   :  { %2647 = vmatmul.mubr.msk.f32.vlgmr.msra.gmra.mrb[20].mxu0 %vm1058_vm3, %v1232_v41 }
 0x4b9   :  { %2797 = vmatpush3.bf16.msra.mxu0 %v2794_v45 }
 0x4ba   :  { %2799 = vmatprep.subr.bf16.mxu0 %v2798_v54 }
 0x4bd   :  { %2801 = vmatpush3.bf16.msra.mxu0 %v2798_v54 }
 0x4be   :  { %2803 = vmatprep.subr.bf16.mxu0 %v2802_v35 }
 0x4d7   :  { %v1199_v13 = vpop.xlane.xlu1 %1198 }
 0x4d8   :  { %3006 = vrcp.f32 %v1199_v13  ;;  %v3603_v13 = vld [vmem:[%s3702_s0] sm:$0xff] }
 0x4db   :  { %v2941_v4 = vpop.permute.xlu1 %2940 }
 0x4dc   :  { %v2943_v0 = vunpack.i.h.bf16 %v2941_v4  ;;  %v2942_v14 = vunpack.i.l.bf16 %v2941_v4  ;;  %v3610_v4 = vld [vmem:[%s3702_s0 + $0x8] sm:$0xff] }
 0x4de   :  { %v2790_v15 = vpack.c.bf16 %v2943_v0, %v2942_v14  ;;  %v3617_v0 = vld [vmem:[%s3702_s0 + $0x10] sm:$0xff]  ;;  %v3624_v14 = vld [vmem:[%s3702_s0 + $0x18] sm:$0xff] }
 0x4e0   :  { %2791 = vmatprep.subr.bf16.mxu1 %v2790_v15 }
 0x4e1   :  { %2793 = vmatpush3.bf16.msra.mxu1 %v2790_v15  ;;  %v3631_v15 = vld [vmem:[%s3709_s7] sm:$0xf] }
 0x4e2   :  { %v3007_v17 = vpop.eup %3006  ;;  %v2138_v43 = vrot.slane %v3631_v15, %v91_v23 }
 0x4e3   :  { %v1233_v18 = vmul.f32 %v3007_v17, %v3539_v16 }
 0x4e5   :  { %2653 = vmatprep.mubr.msk.f32.mxu1 %vm1058_vm3, %v1233_v18 }
 0x4e6   :  { %2654 = vmatmul.mubr.msk.f32.vlgmr.msra.gmra.mrb[16].mxu1 %vm1058_vm3, %v1234_v8 }
 0x550   :  { %v2606_v5 = vpop.f32.mrb[14].mxu0 }
 0x551   :  { %v1307_v20 = vpop.f32.mrb[15].mxu0 }
 0x576   :  { %v2613_v28 = vpop.f32.mrb[10].mxu1 }
 0x577   :  { %1887 = vrot.lane.b32.xlu1 %v2613_v28, %s3125_s18  ;;  %v1388_v9 = vpop.f32.mrb[11].mxu1 }
 0x578   :  { %1885 = vrot.lane.b32.xlu0 %v1388_v9, %s3125_s18 }
 0x57a   :  { %v2620_v16 = vpop.f32.mrb[16].mxu0 }
 0x57b   :  { %1895 = vrot.lane.b32.xlu1 %v2620_v16, %s3133_s5  ;;  %v1469_v30 = vpop.f32.mrb[17].mxu0 }
 0x57c   :  { %1893 = vrot.lane.b32.xlu0 %v1469_v30, %s3133_s5 }
 0x57e   :  { %v2627_v29 = vpop.f32.mrb[12].mxu1 }
 0x57f   :  { %1903 = vrot.lane.b32.xlu1 %v2627_v29, %s3134_s27  ;;  %v1550_v32 = vpop.f32.mrb[13].mxu1 }
 0x580   :  { %1901 = vrot.lane.b32.xlu0 %v1550_v32, %s3134_s27 }
 0x583   :  { %v2634_v36 = vpop.f32.mrb[18].mxu0 }
 0x584   :  { %v1631_v34 = vpop.f32.mrb[19].mxu0 }
 0x587   :  { %v2641_v40 = vpop.f32.mrb[14].mxu1 }
 0x588   :  { %1918 = vrot.lane.b32.xlu1 %v2641_v40, %s3125_s18  ;;  %v1712_v33 = vpop.f32.mrb[15].mxu1 }
 0x589   :  { %1916 = vrot.lane.b32.xlu0 %v1712_v33, %s3125_s18 }
 0x58b   :  { %v2648_v46 = vpop.f32.mrb[20].mxu0 }
 0x58c   :  { %v1793_v47 = vpop.f32.mrb[21].mxu0  ;;  %1926 = vrot.lane.b32.xlu1 %v2648_v46, %s3133_s5 }
 0x58d   :  { %1924 = vrot.lane.b32.xlu0 %v1793_v47, %s3133_s5 }
 0x5b9   :  { %v2655_v48 = vpop.f32.mrb[16].mxu1 }
 0x5ba   :  { %1934 = vrot.lane.b32.xlu1 %v2655_v48, %s3134_s27  ;;  %v1874_v49 = vpop.f32.mrb[17].mxu1 }
 0x5bb   :  { %1932 = vrot.lane.b32.xlu0 %v1874_v49, %s3134_s27 }
 0x5e9   :  { %v1888_v50 = vpop.permute.xlu1 %1887 }
 0x5ea   :  { %v1886_v39 = vpop.permute.xlu0 %1885  ;;  %v1908_v37 = vsel %vm365_vm1, %v2606_v5, %v1888_v50 }
 0x5eb   :  { %v1907_v58 = vsel %vm365_vm1, %v1307_v20, %v1886_v39 }
 0x5ed   :  { %v1896_v52 = vpop.permute.xlu1 %1895 }
 0x5ee   :  { %v1894_v31 = vpop.permute.xlu0 %1893  ;;  %v1910_v38 = vsel %vm1058_vm3, %v1908_v37, %v1896_v52 }
 0x5ef   :  { %v1909_v60 = vsel %vm1058_vm3, %v1907_v58, %v1894_v31  ;;  %v2249_v31 = vld [vmem:[%s3708_s6] sm:$0xff] }
 0x5f0   :  { %v2810_v58 = vpack.c.bf16 %v2250_v10, %v2249_v31 }
 0x5f1   :  { %v1904_v59 = vpop.permute.xlu1 %1903 }
 0x5f2   :  { %v1902_v61 = vpop.permute.xlu0 %1901  ;;  %v1913_v63 = vsel %vm1911_vm4, %v1910_v38, %v1904_v59  ;;  %v2252_v59 = vld [vmem:[%s3708_s6 + $0x18] sm:$0xff]  ;;  %2811 = vmatprep.subr.bf16.mxu1 %v2810_v58 }
 0x5f3   :  { %v1912_v19 = vsel %vm1911_vm4, %v1909_v60, %v1902_v61  ;;  %v2814_v37 = vpack.c.bf16 %v2252_v59, %v2251_v56  ;;  %v2253_v60 = vld [vmem:[%s3708_s6 + $0x20] sm:$0xff]  ;;  %v2254_v61 = vld [vmem:[%s3708_s6 + $0x28] sm:$0xff]  ;;  %2813 = vmatpush3.bf16.msra.mxu1 %v2810_v58 }
 0x5f4   :  { %2664 = vmatprep.mubr.msk.f32.mxu0 %vm99_vm0, %v1912_v19  ;;  %v2818_v38 = vpack.c.bf16 %v2254_v61, %v2253_v60  ;;  %v2255_v19 = vld [vmem:[%s3708_s6 + $0x30] sm:$0xff] }
 0x5f5   :  { %2665 = vmatmul.mubr.msk.f32.vlgmr.msra.gmra.mrb[22].mxu0 %vm99_vm0, %v1913_v63  ;;  %2815 = vmatprep.subr.bf16.mxu1 %v2814_v37 }
 0x5f6   :  { %2805 = vmatpush3.bf16.msra.mxu0 %v2802_v35 }
 0x5f7   :  { %2807 = vmatprep.subr.bf16.mxu0 %v2806_v62  ;;  %2817 = vmatpush3.bf16.msra.mxu1 %v2814_v37 }
 0x5f8   :  { %2819 = vmatprep.subr.bf16.mxu1 %v2818_v38 }
 0x5fa   :  { %2809 = vmatpush3.bf16.msra.mxu0 %v2806_v62  ;;  %v1919_v1 = vpop.permute.xlu1 %1918  ;;  %v2256_v62 = vld [vmem:[%s3708_s6 + $0x38] sm:$0xff]  ;;  %s3135_s6 = smov [#allocation8]  }
 0x5fb   :  { %v1917_v2 = vpop.permute.xlu0 %1916  ;;  %v1939_v53 = vsel %vm365_vm1, %v2634_v36, %v1919_v1  ;;  %v2822_v63 = vpack.c.bf16 %v2256_v62, %v2255_v19  ;;  %2821 = vmatpush3.bf16.msra.mxu1 %v2818_v38  ;;  %s2375_s27 = sshll.u32 %s3135_s6, 4  ;;  %s2376_s27 = int_to_ptr.vmem [resolvable:$true] %s2375_s27 }
 0x5fc   :  { %v1938_v6 = vsel %vm365_vm1, %v1631_v34, %v1917_v2  ;;  %s3094_s29 = scalar_lea.vmem %s2376_s27, 512  ;;  %p3099_p11 = scmp.lt.s32.totalorder %s2376_s27, %s2376_s27 }
 0x5fd   :  { %2823 = vmatprep.subr.bf16.mxu1 %v2822_v63  ;;  %p3095_p10 = scmp.ne.s32.totalorder %s2376_s27, %s3094_s29  ;;  %p3100_p12 = scmp.lt.s32.totalorder %s3094_s29, %s3094_s29 }
 0x5fe   :  { %v1927_v55 = vpop.permute.xlu1 %1926 }
 0x5ff   :  { %v1925_v3 = vpop.permute.xlu0 %1924  ;;  %v1941_v12 = vsel %vm1058_vm3, %v1939_v53, %v1927_v55  ;;  %2825 = vmatpush3.bf16.msra.mxu1 %v2822_v63  ;;  %p3101_p13 = por %p3100_p12, %p3099_p11 }
 0x600   :  { %v1940_v7 = vsel %vm1058_vm3, %v1938_v6, %v1925_v3 }
 0x601   :  { %p3102_p0 = pnand %p3101_p13, %p3095_p10 }
 0x62c   :  { %v1935_v44 = vpop.permute.xlu1 %1934 }
 0x62d   :  { %v1933_v11 = vpop.permute.xlu0 %1932  ;;  %v1943_v41 = vsel %vm1911_vm4, %v1941_v12, %v1935_v44 }
 0x62e   :  { %v1942_v42 = vsel %vm1911_vm4, %v1940_v7, %v1933_v11 }
 0x62f   :  { %2667 = vmatprep.mubr.msk.f32.mxu0 %vm99_vm0, %v1942_v42 }
 0x630   :  { %2668 = vmatmul.mubr.msk.f32.gmra.mrb[24].mxu0 %vm99_vm0, %v1943_v41  ;;  %v2207_v41 = vsub.s32 2, %v3289_v22 }
 0x631   :  { %2678 = vmatprep.mubr.msk.f32.mxu0 %vm99_vm0, %v3603_v13 }
 0x634   :  { %2679 = vmatmul.mubr.msk.f32.vlgmr.msra.gmra.mrb[22].mxu0 %vm99_vm0, %v3610_v4 }
 0x635   :  { %2681 = vmatprep.mubr.msk.f32.mxu0 %vm99_vm0, %v3617_v0 }
 0x638   :  { %2682 = vmatmul.mubr.msk.f32.gmra.mrb[24].mxu0 %vm99_vm0, %v3624_v14 }
 0x707   :  { %v2680_v17 = vpop.f32.mrb[22].mxu0 }
 0x708   :  { %v2140_v18 = vadd.f32 %v2680_v17, %v2138_v43  ;;  %v2116_v8 = vpop.f32.mrb[23].mxu0  ;;  %v2200_v17 = vrot.slane %v3631_v15, %v95_v26 }
 0x709   :  { %v2139_v5 = vadd.f32 %v2138_v43, %v2116_v8 }
 0x70a   :  { %v2147_v20 = vsel %vm2143_vm5, %v2140_v18, 0.0 }
 0x70b   :  { %2148 = vadd.xlane.f32.xlu1 %v2147_v20  ;;  %v2683_v21 = vpop.f32.mrb[24].mxu0  ;;  %v2144_v24 = vsel %vm2143_vm5, %v2139_v5, 0.0 }
 0x70c   :  { %2145 = vadd.xlane.f32.xlu0 %v2144_v24  ;;  %v2126_v45 = vpop.f32.mrb[25].mxu0  ;;  %v2142_v27 = vadd.f32 %v2683_v21, %v2138_v43 }
 0x70d   :  { %v2141_v25 = vadd.f32 %v2138_v43, %v2126_v45 }
 0x70e   :  { %v2153_v23 = vsel %vm2143_vm5, %v2142_v27, 0.0 }
 0x70f   :  { %v2150_v54 = vsel %vm2143_vm5, %v2141_v25, 0.0 }
 0x710   :  { %2151 = vadd.xlane.f32.xlu0 %v2150_v54 }
 0x714   :  { %2154 = vadd.xlane.f32.xlu0 %v2153_v23 }
 0x798   :  { %v2149_v28 = vpop.xlane.xlu1 %2148 }
 0x799   :  { %v2158_v9 = vmul.f32 0.015625, %v2149_v28  ;;  %v2146_v16 = vpop.xlane.xlu0 %2145 }
 0x79a   :  { %v2157_v30 = vmul.f32 0.015625, %v2146_v16 }
 0x79b   :  { %v2162_v29 = vsub.f32 %v2140_v18, %v2158_v9 }
 0x79c   :  { %v2161_v32 = vsub.f32 %v2139_v5, %v2157_v30  ;;  %v2208_v5 = vrot.slane %v3631_v15, %v2207_v41 }
 0x79d   :  { %v2152_v57 = vpop.xlane.xlu0 %2151  ;;  %v2166_v51 = vmul.f32 %v2162_v29, %v2162_v29 }
 0x79e   :  { %v2159_v35 = vmul.f32 0.015625, %v2152_v57  ;;  %v2165_v36 = vmul.f32 %v2161_v32, %v2161_v32 }
 0x79f   :  { %v2172_v34 = vsel %vm2143_vm5, %v2166_v51, 0.0 }
 0x7a0   :  { %v2163_v40 = vsub.f32 %v2141_v25, %v2159_v35  ;;  %2173 = vadd.xlane.f32.xlu0 %v2172_v34  ;;  %v2169_v33 = vsel %vm2143_vm5, %v2165_v36, 0.0 }
 0x7a1   :  { %2170 = vadd.xlane.f32.xlu1 %v2169_v33  ;;  %v2155_v46 = vpop.xlane.xlu0 %2154 }
 0x7a2   :  { %v2160_v47 = vmul.f32 0.015625, %v2155_v46  ;;  %v2167_v48 = vmul.f32 %v2163_v40, %v2163_v40 }
 0x7a4   :  { %v2164_v49 = vsub.f32 %v2142_v27, %v2160_v47  ;;  %v2175_v50 = vsel %vm2143_vm5, %v2167_v48, 0.0 }
 0x7a5   :  { %2176 = vadd.xlane.f32.xlu1 %v2175_v50 }
 0x7a6   :  { %v2168_v39 = vmul.f32 %v2164_v49, %v2164_v49 }
 0x7a8   :  { %v2178_v52 = vsel %vm2143_vm5, %v2168_v39, 0.0 }
 0x7a9   :  { %2179 = vadd.xlane.f32.xlu0 %v2178_v52 }
 0x82d   :  { %v2174_v1 = vpop.xlane.xlu0 %2173 }
 0x82e   :  { %v2182_v2 = vmul.f32 0.015625, %v2174_v1  ;;  %v2171_v55 = vpop.xlane.xlu1 %2170 }
 0x82f   :  { %v2181_v3 = vmul.f32 0.015625, %v2171_v55 }
 0x830   :  { %v2186_v6 = vadd.f32 1e-05, %v2182_v2 }
 0x831   :  { %v2185_v44 = vadd.f32 1e-05, %v2181_v3 }
 0x832   :  { %3008 = vrsqrt.f32 %v2186_v6  ;;  %v2177_v53 = vpop.xlane.xlu1 %2176 }
 0x833   :  { %3010 = vrsqrt.f32 %v2185_v44  ;;  %v2183_v7 = vmul.f32 0.015625, %v2177_v53 }
 0x835   :  { %v2187_v11 = vadd.f32 1e-05, %v2183_v7 }
 0x836   :  { %v2180_v12 = vpop.xlane.xlu0 %2179 }
 0x837   :  { %3012 = vrsqrt.f32 %v2187_v11  ;;  %v2184_v42 = vmul.f32 0.015625, %v2180_v12  ;;  %v2360_v12 = vsub.s32 3, %v3289_v22 }
 0x839   :  { %v2188_v43 = vadd.f32 1e-05, %v2184_v42  ;;  %v2361_v42 = vrot.slane %v3631_v15, %v2360_v12 }
 0x83b   :  { %3014 = vrsqrt.f32 %v2188_v43 }
 0x83c   :  { %v3009_v18 = vpop.eup %3008 }
 0x83d   :  { %v3011_v8 = vpop.eup %3010  ;;  %v2194_v20 = vmul.f32 %v3009_v18, %v2162_v29 }
 0x83e   :  { %v2193_v21 = vmul.f32 %v3011_v8, %v2161_v32 }
 0x83f   :  { %v2202_v24 = vmul.f32 %v2200_v17, %v2194_v20 }
 0x840   :  { %v2201_v45 = vmul.f32 %v2200_v17, %v2193_v21 }
 0x841   :  { %v3013_v25 = vpop.eup %3012  ;;  %v2210_v27 = vadd.f32 %v2208_v5, %v2202_v24 }
 0x842   :  { %v2209_v54 = vadd.f32 %v2208_v5, %v2201_v45  ;;  %v2195_v23 = vmul.f32 %v3013_v25, %v2163_v40 }
 0x843   :  { %v2218_v28 = vmul.f32 0.044715, %v2210_v27  ;;  %v2214_v62 = vmul.f32 0.5, %v2210_v27 }
 0x844   :  { %v2203_v9 = vmul.f32 %v2200_v17, %v2195_v23  ;;  %v2217_v16 = vmul.f32 0.044715, %v2209_v54  ;;  %v2213_v38 = vmul.f32 0.5, %v2209_v54 }
 0x845   :  { %v3015_v30 = vpop.eup %3014  ;;  %v2222_v57 = vmul.f32 %v2218_v28, %v2210_v27 }
 0x846   :  { %v2211_v51 = vadd.f32 %v2208_v5, %v2203_v9  ;;  %v2196_v26 = vmul.f32 %v3015_v30, %v2164_v49  ;;  %v2221_v35 = vmul.f32 %v2217_v16, %v2209_v54 }
 0x847   :  { %v2226_v36 = vmul.f32 %v2222_v57, %v2210_v27 }
 0x848   :  { %v2204_v34 = vmul.f32 %v2200_v17, %v2196_v26  ;;  %v2225_v33 = vmul.f32 %v2221_v35, %v2209_v54  ;;  %v2219_v46 = vmul.f32 0.044715, %v2211_v51  ;;  %v2215_v55 = vmul.f32 0.5, %v2211_v51 }
 0x849   :  { %v2230_v29 = vadd.f32 %v2226_v36, %v2210_v27 }
 0x84a   :  { %v2212_v32 = vadd.f32 %v2208_v5, %v2204_v34  ;;  %v2229_v47 = vadd.f32 %v2225_v33, %v2209_v54  ;;  %v2223_v48 = vmul.f32 %v2219_v46, %v2211_v51 }
 0x84b   :  { %v2234_v50 = vmul.f32 0.7978846, %v2230_v29 }
 0x84c   :  { %v2233_v39 = vmul.f32 0.7978846, %v2229_v47  ;;  %v2227_v52 = vmul.f32 %v2223_v48, %v2211_v51  ;;  %v2220_v40 = vmul.f32 0.044715, %v2212_v32  ;;  %v2216_v53 = vmul.f32 0.5, %v2212_v32 }
 0x84d   :  { %3016 = vtanh.f32 %v2234_v50 }
 0x84e   :  { %3018 = vtanh.f32 %v2233_v39  ;;  %v2231_v31 = vadd.f32 %v2227_v52, %v2211_v51  ;;  %v2224_v10 = vmul.f32 %v2220_v40, %v2212_v32 }
 0x850   :  { %v2235_v56 = vmul.f32 0.7978846, %v2231_v31  ;;  %v2228_v58 = vmul.f32 %v2224_v10, %v2212_v32 }
 0x852   :  { %3020 = vtanh.f32 %v2235_v56  ;;  %v2232_v49 = vadd.f32 %v2228_v58, %v2212_v32 }
 0x854   :  { %v2236_v59 = vmul.f32 0.7978846, %v2232_v49 }
 0x856   :  { %3022 = vtanh.f32 %v2236_v59 }
 0x857   :  { %v3017_v37 = vpop.eup %3016 }
 0x858   :  { %v3019_v60 = vpop.eup %3018  ;;  %v2242_v61 = vadd.f32 1.0, %v3017_v37 }
 0x859   :  { %v2241_v19 = vadd.f32 1.0, %v3019_v60 }
 0x85a   :  { %v2246_v2 = vmul.f32 %v2242_v61, %v2214_v62 }
 0x85b   :  { %v2245_v63 = vmul.f32 %v2241_v19, %v2213_v38 }
 0x85c   :  { %v3021_v1 = vpop.eup %3020 }
 0x85d   :  { %2700 = vmatprep.mubr.msk.f32.mxu1 %vm2143_vm5, %v2245_v63  ;;  %v2243_v3 = vadd.f32 1.0, %v3021_v1 }
 0x85e   :  { %2701 = vmatmul.mubr.msk.f32.vlgmr.msra.gmra.mrb[18].mxu1 %vm2143_vm5, %v2246_v2 }
 0x85f   :  { %v2247_v6 = vmul.f32 %v2243_v3, %v2215_v55 }
 0x860   :  { %v3023_v44 = vpop.eup %3022 }
 0x861   :  { %2703 = vmatprep.mubr.msk.f32.mxu1 %vm2143_vm5, %v2247_v6  ;;  %v2244_v7 = vadd.f32 1.0, %v3023_v44 }
 0x863   :  { %v2248_v11 = vmul.f32 %v2244_v7, %v2216_v53 }
 0x865   :  { %2704 = vmatmul.mubr.msk.f32.gmra.mrb[20].mxu1 %vm2143_vm5, %v2248_v11 }
 0x931   :  { %v2702_v41 = vpop.f32.mrb[18].mxu1 }
 0x932   :  { %v2355_v43 = vadd.f32 %v3610_v4, %v2702_v41  ;;  %v2335_v17 = vpop.f32.mrb[19].mxu1 }
 0x933   :  { %v2354_v18 = vadd.f32 %v3603_v13, %v2335_v17 }
 0x934   :  { %v2363_v8 = vadd.f32 %v2361_v42, %v2355_v43 }
 0x935   :  { %v2362_v5 = vadd.f32 %v2361_v42, %v2354_v18 }
 0x936   :  { %2367 = vst.msk [vmem:[#allocation8 + $0x8] sm:$0xff] %vm99_vm0, %v2363_v8 }
 0x937   :  { %2366 = vst.msk [vmem:[#allocation8] sm:$0xff] %vm99_vm0, %v2362_v5 }
 0x938   :  { %v2705_v20 = vpop.f32.mrb[20].mxu1 }
 0x939   :  { %v2357_v21 = vadd.f32 %v3624_v14, %v2705_v20  ;;  %v2345_v24 = vpop.f32.mrb[21].mxu1 }
 0x93a   :  { %v2356_v22 = vadd.f32 %v3617_v0, %v2345_v24 }
 0x93b   :  { %v2365_v15 = vadd.f32 %v2361_v42, %v2357_v21 }
 0x93c   :  { %v2364_v45 = vadd.f32 %v2361_v42, %v2356_v22 }
 0x93d   :  { %2369 = vst.msk [vmem:[#allocation8 + $0x18] sm:$0xff] %vm99_vm0, %v2365_v15 }
 0x93e   :  { %2368 = vst.msk [vmem:[#allocation8 + $0x10] sm:$0xff] %vm99_vm0, %v2364_v45 }
 0x93f   :  { %3105 = shalt.err (!%p3102_p0)
}
 0x940   :  { %s3106_s9 = scalar_lea.hbm %s3710_s8, 512 }
 0x941   :  { %p3107_p1 = scmp.ne.s32.totalorder %s3710_s8, %s3106_s9  ;;  %p3110_p2 = scmp.lt.u32.totalorder %s3106_s9, %s3710_s8 }
 0x943   :  { %p3112_p3 = pnand %p3110_p2, %p3107_p1 }
 0x945   :  { %3115 = shalt.err (!%p3112_p3)
}
 0x946   :  { %2381 = dma.vmem_to_hbm [thread:$0]  %s2376_s27, 512, %s3710_s8, [#allocation4], %s3124_s17, %s3124_s17, %s3125_s18  }
 0x947   :  { %3120 = dma.done.wait [#allocation4], 512  }
 0x948   :  { %3121 = vsyncadd [#allocation4], 4294966784 }
 0x949   :  { %2385 = vsyncpa [#allocation3], 1 }
 0x94a   :  { %2386 = vsyncpa [#allocation6], 1 }
 0x94b   :  { %2387 = vsyncpa [#allocation4], 1 }

</bundles_post_ra>
